<compile_context>
chip_gen: v7x
topology: tpu7x:2x2x1
jax: 0.10.0
libtpu: 0.0.40
codegen_flags: <defaults>
</compile_context>

<pallas_src>
import functools
import math

import jax
import jax.numpy as jnp
from jax.experimental import pallas as pl
from jax.experimental.pallas import tpu as pltpu

LANE = 128
SUBLANE = 8


def _round_up(x, m):
    return (x + m - 1) // m * m


# --------------------------------------------------------------------------- #
# Kernel body
# --------------------------------------------------------------------------- #
def vae_forward_kernel(
    x_ref,       # (TB, Dp)    f32   flattened input tile (zero-padded)
    encw_ref,    # (Dp, F)     bf16  encoder weight
    encb_ref,    # (1, F)      f32   encoder bias
    headw_ref,   # (F, 2*Zp)   bf16  fused [mean | logvar] head weight
    headb_ref,   # (1, 2*Zp)   f32   fused head bias
    eps_ref,     # (TB, Zp)    f32   N(0,1) noise tile (zero-padded)
    d1w_ref,     # (Zp, F)     bf16  decoder hidden weight
    d1b_ref,     # (1, F)      f32   decoder hidden bias
    d2w_ref,     # (F, Dp)     bf16  decoder output weight
    d2b_ref,     # (1, Dp)     f32   decoder output bias
    recon_ref,   # (TB, Dp)    bf16  out: mode of p(x|z)
    stats_ref,   # (TB, 128)   f32   out: lane 0 = nll, lane 1 = kl
    *,
    nll_const,   # 0.5 * d_in_real * log(2*pi)
):
    x = x_ref[...]                                                     # f32

    # ---- encoder: Linear + ReLU (bf16 MXU, f32 accumulate) ----
    h = jnp.dot(x.astype(jnp.bfloat16), encw_ref[...],
                preferred_element_type=jnp.float32) + encb_ref[...]
    h = jnp.maximum(h, 0.0)

    # ---- fused posterior head: one matmul -> [mean | logvar] ----
    zp = eps_ref.shape[1]
    ml = jnp.dot(h.astype(jnp.bfloat16), headw_ref[...],
                 preferred_element_type=jnp.float32) + headb_ref[...]
    mean = ml[:, :zp]
    logvar = ml[:, zp:]

    # ---- reparameterized sample z = mean + std * eps ----
    std = jnp.exp(0.5 * logvar)
    z = mean + std * eps_ref[...]

    # ---- decoder: Linear + ReLU + Linear -> mean of p(x|z) ----
    hd = jnp.dot(z.astype(jnp.bfloat16), d1w_ref[...],
                 preferred_element_type=jnp.float32) + d1b_ref[...]
    hd = jnp.maximum(hd, 0.0)
    x_rec = jnp.dot(hd.astype(jnp.bfloat16), d2w_ref[...],
                    preferred_element_type=jnp.float32) + d2b_ref[...]

    # bf16 writeback (halves the dominant output stream); keep f32 for nll.
    recon_ref[...] = x_rec.astype(recon_ref.dtype)

    # recon.nll(x): padded columns of x and x_rec are both zero -> contribute 0.
    diff = x - x_rec
    nll = jnp.float32(nll_const) + 0.5 * jnp.sum(diff * diff, axis=-1,
                                                 keepdims=True)

    # posterior.kl(): reuse std (var = std*std). Padded latent lanes have
    # mean = logvar = 0 -> contribute exactly 0.
    var = std * std
    kl = 0.5 * jnp.sum(mean * mean + var - 1.0 - logvar, axis=-1, keepdims=True)

    # Lane-dense packed stats tile: lane 0 = nll, lane 1 = kl, rest 0.
    col = jax.lax.broadcasted_iota(jnp.int32, stats_ref.shape, 1)
    stats_ref[...] = jnp.where(col == 0, nll, jnp.where(col == 1, kl, 0.0))


# --------------------------------------------------------------------------- #
# One-time weight prepack (do NOT call per-forward)
# --------------------------------------------------------------------------- #
def prepack_params(params, *, d_in, z_dim):
    """Zero-pad to lane multiples, fuse the mean|logvar head into one matmul,
    and cast matmul weights to bf16. Returns a dict to be reused across calls."""
    feature = params["enc_w"].shape[1]
    d_pad = _round_up(d_in, LANE)
    z_pad = _round_up(max(z_dim, 1), LANE)

    enc_w = (jnp.zeros((d_pad, feature), jnp.float32)
             .at[:d_in, :].set(params["enc_w"])).astype(jnp.bfloat16)
    enc_b = params["enc_b"].reshape(1, feature).astype(jnp.float32)

    head_w = jnp.zeros((feature, 2 * z_pad), jnp.float32)
    head_w = head_w.at[:, :z_dim].set(params["mean_w"])
    head_w = head_w.at[:, z_pad:z_pad + z_dim].set(params["logvar_w"])
    head_w = head_w.astype(jnp.bfloat16)
    head_b = jnp.zeros((1, 2 * z_pad), jnp.float32)
    head_b = head_b.at[:, :z_dim].set(params["mean_b"].reshape(1, -1))
    head_b = head_b.at[:, z_pad:z_pad + z_dim].set(
        params["logvar_b"].reshape(1, -1))

    d1w = (jnp.zeros((z_pad, feature), jnp.float32)
           .at[:z_dim, :].set(params["dec_w1"])).astype(jnp.bfloat16)
    d1b = params["dec_b1"].reshape(1, feature).astype(jnp.float32)
    d2w = (jnp.zeros((feature, d_pad), jnp.float32)
           .at[:, :d_in].set(params["dec_w2"])).astype(jnp.bfloat16)
    d2b = (jnp.zeros((1, d_pad), jnp.float32)
           .at[:, :d_in].set(params["dec_b2"].reshape(1, -1)))

    packed = dict(d_in=d_in, z_dim=z_dim, feature=feature,
                  d_pad=d_pad, z_pad=z_pad,
                  enc_w=enc_w, enc_b=enc_b, head_w=head_w, head_b=head_b,
                  d1w=d1w, d1b=d1b, d2w=d2w, d2b=d2b)
    return jax.block_until_ready(packed)


# --------------------------------------------------------------------------- #
# Forward wrapper
# --------------------------------------------------------------------------- #
def vae_forward(x_nchw, packed, eps):
    """x_nchw: (B,C,H,W) f32; packed: prepack_params(...) output; eps: (B,z) f32.
    Returns (recon (B,C,H,W) bf16, nll (B,) f32, kl (B,) f32)."""
    B, C, H, W = x_nchw.shape
    d_in, z_dim, feature = packed["d_in"], packed["z_dim"], packed["feature"]
    d_pad, z_pad = packed["d_pad"], packed["z_pad"]
    assert C * H * W == d_in

    weight_bytes = 2 * (d_pad * feature + feature * 2 * z_pad
                        + z_pad * feature + feature * d_pad)        # bf16
    bias_bytes = 4 * (feature + 2 * z_pad + feature + d_pad)        # f32

    # Batch tile: 128 baseline; bump to 256 for big batches only when the
    # footprint stays well inside v7x's 64 MiB per-TC VMEM (v5e stays at 128).
    tb = 128 if B >= 128 else _round_up(max(B, 1), SUBLANE)
    if B >= 256:
        act256 = 4 * 256 * (d_pad + z_pad + 128) + 2 * 256 * d_pad
        if 2 * act256 + weight_bytes + bias_bytes < (24 << 20):
            tb = 256
    b_pad = _round_up(B, tb)
    n_tiles = b_pad // tb

    # ---- activations: pad only when actually needed ----
    x_flat = x_nchw.reshape(B, d_in).astype(jnp.float32)
    x_p = x_flat if (b_pad == B and d_pad == d_in) else jnp.pad(
        x_flat, ((0, b_pad - B), (0, d_pad - d_in)))
    eps_f = eps.astype(jnp.float32)
    eps_p = eps_f if (b_pad == B and z_pad == z_dim) else jnp.pad(
        eps_f, ((0, b_pad - B), (0, z_pad - z_dim)))

    # ---- advisory cost estimate for the surrounding XLA scheduler ----
    flops = 2 * b_pad * (d_pad * feature + feature * 2 * z_pad
                         + z_pad * feature + feature * d_pad)
    bytes_accessed = (4 * b_pad * d_pad + 4 * b_pad * z_pad
                      + weight_bytes + bias_bytes
                      + 2 * b_pad * d_pad + 4 * b_pad * 128)
    cost = pl.CostEstimate(flops=flops, transcendentals=b_pad * z_pad,
                           bytes_accessed=bytes_accessed)

    kernel = functools.partial(
        vae_forward_kernel,
        nll_const=0.5 * d_in * math.log(2.0 * math.pi))

    out_shape = (
        jax.ShapeDtypeStruct((b_pad, d_pad), jnp.bfloat16),   # recon (bf16)
        jax.ShapeDtypeStruct((b_pad, 128), jnp.float32),      # packed nll/kl
    )
    row_map = lambda i: (i, 0)     # follows the batch-tile grid axis
    const_map = lambda i: (0, 0)   # weights stay resident across grid steps

    def _run(single_buffer_weights):
        # Const-mapped blocks are revisited with the same index every step, so
        # single-buffering them halves their VMEM footprint with no perf cost.
        wkw = ({"pipeline_mode": pl.Buffered(1)}
               if single_buffer_weights else {})
        in_specs = [
            pl.BlockSpec((tb, d_pad), row_map),                     # x tile
            pl.BlockSpec((d_pad, feature), const_map, **wkw),       # enc_w
            pl.BlockSpec((1, feature), const_map, **wkw),           # enc_b
            pl.BlockSpec((feature, 2 * z_pad), const_map, **wkw),   # head_w
            pl.BlockSpec((1, 2 * z_pad), const_map, **wkw),         # head_b
            pl.BlockSpec((tb, z_pad), row_map),                     # eps tile
            pl.BlockSpec((z_pad, feature), const_map, **wkw),       # d1w
            pl.BlockSpec((1, feature), const_map, **wkw),           # d1b
            pl.BlockSpec((feature, d_pad), const_map, **wkw),       # d2w
            pl.BlockSpec((1, d_pad), const_map, **wkw),             # d2b
        ]
        out_specs = (
            pl.BlockSpec((tb, d_pad), row_map),
            pl.BlockSpec((tb, 128), row_map),
        )
        wbuf = 1 if single_buffer_weights else 2
        act_bytes = 4 * tb * (d_pad + z_pad + 128) + 2 * tb * d_pad
        vmem_limit = int(min(max(2 * act_bytes
                                 + wbuf * (weight_bytes + bias_bytes)
                                 + (2 << 20),
                                 8 << 20),
                             32 << 20))
        return pl.pallas_call(
            kernel,
            out_shape=out_shape,
            grid=(n_tiles,),
            in_specs=in_specs,
            out_specs=out_specs,
            cost_estimate=cost,
            compiler_params=pltpu.CompilerParams(
                dimension_semantics=("parallel",),
                vmem_limit_bytes=vmem_limit,
            ),
        )(x_p, packed["enc_w"], packed["enc_b"], packed["head_w"],
          packed["head_b"], eps_p, packed["d1w"], packed["d1b"],
          packed["d2w"], packed["d2b"])

    try:
        recon_p, stats = _run(True)
    except Exception:
        # pl.Buffered(1) not accepted by this compiler -> default buffering.
        recon_p, stats = _run(False)

    recon = recon_p if (b_pad == B and d_pad == d_in) else recon_p[:B, :d_in]
    recon = recon.reshape(B, C, H, W)
    return recon, stats[:B, 0], stats[:B, 1]


# --------------------------------------------------------------------------- #
# Parameter init (PyTorch-style uniform +/- 1/sqrt(fan_in), f32)
# --------------------------------------------------------------------------- #
def init_params(key, d_in, feature_size, z_dim):
    def linear(key, fan_in, fan_out):
        kw, kb = jax.random.split(key)
        bound = 1.0 / math.sqrt(fan_in)
        w = jax.random.uniform(kw, (fan_in, fan_out), jnp.float32, -bound, bound)
        b = jax.random.uniform(kb, (1, fan_out), jnp.float32, -bound, bound)
        return w, b

    keys = jax.random.split(key, 5)
    enc_w, enc_b = linear(keys[0], d_in, feature_size)
    mean_w, mean_b = linear(keys[1], feature_size, z_dim)
    logvar_w, logvar_b = linear(keys[2], feature_size, z_dim)
    dec_w1, dec_b1 = linear(keys[3], z_dim, feature_size)
    dec_w2, dec_b2 = linear(keys[4], feature_size, d_in)
    return dict(enc_w=enc_w, enc_b=enc_b,
                mean_w=mean_w, mean_b=mean_b,
                logvar_w=logvar_w, logvar_b=logvar_b,
                dec_w1=dec_w1, dec_b1=dec_b1,
                dec_w2=dec_w2, dec_b2=dec_b2)


if __name__ == "__main__":
    # Small shapes consistent with the module's forward.
    B, C, H, W = 2, 4, 16, 16
    D_IN = C * H * W          # 1024
    FEATURE_SIZE = 128        # encoder output / heads' input
    Z_DIM = 32                # latent dimension

    root = jax.random.PRNGKey(0)
    k_x, k_params, k_eps = jax.random.split(root, 3)

    x = jax.random.normal(k_x, (B, C, H, W), jnp.float32)
    params = init_params(k_params, D_IN, FEATURE_SIZE, Z_DIM)
    # eps plays the role of torch.randn_like(mean) in posterior.sample()
    eps = jax.random.normal(k_eps, (B, Z_DIM), jnp.float32)

    packed = prepack_params(params, d_in=D_IN, z_dim=Z_DIM)   # one-time prepack
    recon, nll, kl = vae_forward(x, packed, eps)
    jax.block_until_ready((recon, nll, kl))

    assert recon.shape == (B, C, H, W)
    assert nll.shape == (B,) and kl.shape == (B,)
    assert bool(jnp.all(jnp.isfinite(recon.astype(jnp.float32))))
    assert bool(jnp.all(jnp.isfinite(nll))) and bool(jnp.all(jnp.isfinite(kl)))

    # Pure-JAX f32 reference (loose tolerances: bf16 weight streaming + bf16
    # recon writeback are deliberate precision tradeoffs).
    def ref_forward(xr, p, e):
        xf = xr.reshape(B, -1)
        h = jnp.maximum(xf @ p["enc_w"] + p["enc_b"], 0.0)
        mean = h @ p["mean_w"] + p["mean_b"]
        logvar = h @ p["logvar_w"] + p["logvar_b"]
        z = mean + jnp.exp(0.5 * logvar) * e
        hd = jnp.maximum(z @ p["dec_w1"] + p["dec_b1"], 0.0)
        xrec = hd @ p["dec_w2"] + p["dec_b2"]
        nll_r = 0.5 * jnp.sum(jnp.log(2 * jnp.pi) + (xf - xrec) ** 2, axis=-1)
        kl_r = 0.5 * jnp.sum(mean ** 2 + jnp.exp(logvar) - 1.0 - logvar, axis=-1)
        return xrec.reshape(xr.shape), nll_r, kl_r

    r_ref, nll_ref, kl_ref = ref_forward(x, params, eps)
    assert bool(jnp.allclose(recon.astype(jnp.float32), r_ref,
                             rtol=1e-1, atol=1e-1))
    assert bool(jnp.allclose(nll, nll_ref, rtol=5e-2, atol=1.0))
    assert bool(jnp.allclose(kl, kl_ref, rtol=1e-1, atol=0.5))

    print("KERNEL_OK")
</pallas_src>

<mosaic_0001>
module attributes {stable_mosaic.version = 11 : i64} {
  func.func @vae_forward_kernel(%arg0: i32, %arg1: memref<8x1024xf32, #tpu.memory_space<vmem>>, %arg2: memref<1024x128xbf16, #tpu.memory_space<vmem>>, %arg3: memref<1x128xf32, #tpu.memory_space<vmem>>, %arg4: memref<128x256xbf16, #tpu.memory_space<vmem>>, %arg5: memref<1x256xf32, #tpu.memory_space<vmem>>, %arg6: memref<8x128xf32, #tpu.memory_space<vmem>>, %arg7: memref<128x128xbf16, #tpu.memory_space<vmem>>, %arg8: memref<1x128xf32, #tpu.memory_space<vmem>>, %arg9: memref<128x1024xbf16, #tpu.memory_space<vmem>>, %arg10: memref<1x1024xf32, #tpu.memory_space<vmem>>, %arg11: memref<8x1024xbf16, #tpu.memory_space<vmem>>, %arg12: memref<8x128xf32, #tpu.memory_space<vmem>>) attributes {dimension_semantics = [#tpu.dimension_semantics<parallel>], iteration_bounds = array<i64: 1>, scalar_prefetch = 0 : i64, scratch_operands = 0 : i64, tpu.core_type = #tpu.core_type<tc>, window_params = [{transform_indices = @transform_0, window_bounds = array<i64: 8, 1024>}, {pipeline_mode = #tpu.pipeline_mode<synchronous>, transform_indices = @transform_1, window_bounds = array<i64: 1024, 128>}, {pipeline_mode = #tpu.pipeline_mode<synchronous>, transform_indices = @transform_2, window_bounds = array<i64: 1, 128>}, {pipeline_mode = #tpu.pipeline_mode<synchronous>, transform_indices = @transform_3, window_bounds = array<i64: 128, 256>}, {pipeline_mode = #tpu.pipeline_mode<synchronous>, transform_indices = @transform_4, window_bounds = array<i64: 1, 256>}, {transform_indices = @transform_5, window_bounds = array<i64: 8, 128>}, {pipeline_mode = #tpu.pipeline_mode<synchronous>, transform_indices = @transform_6, window_bounds = array<i64: 128, 128>}, {pipeline_mode = #tpu.pipeline_mode<synchronous>, transform_indices = @transform_7, window_bounds = array<i64: 1, 128>}, {pipeline_mode = #tpu.pipeline_mode<synchronous>, transform_indices = @transform_8, window_bounds = array<i64: 128, 1024>}, {pipeline_mode = #tpu.pipeline_mode<synchronous>, transform_indices = @transform_9, window_bounds = array<i64: 1, 1024>}, {transform_indices = @transform_10, window_bounds = array<i64: 8, 1024>}, {transform_indices = @transform_11, window_bounds = array<i64: 8, 128>}]} {
    %c0 = arith.constant 0 : index
    %c0_0 = arith.constant 0 : index
    %0 = vector.load %arg1[%c0, %c0_0] : memref<8x1024xf32, #tpu.memory_space<vmem>>, vector<8x1024xf32>
    %1 = arith.truncf %0 : vector<8x1024xf32> to vector<8x1024xbf16>
    %c0_1 = arith.constant 0 : index
    %c0_2 = arith.constant 0 : index
    %2 = vector.load %arg2[%c0_1, %c0_2] : memref<1024x128xbf16, #tpu.memory_space<vmem>>, vector<1024x128xbf16>
    %cst = arith.constant dense<0.000000e+00> : vector<8x128xf32>
    %3 = tpu.matmul %1, %2, %cst {dimension_numbers = #tpu.dot_dimension_numbers<[1], [0], [0], [1], [0, 0, 1, 1], [], []>} : vector<8x1024xbf16>, vector<1024x128xbf16>, vector<8x128xf32> -> vector<8x128xf32>
    %c0_3 = arith.constant 0 : index
    %c0_4 = arith.constant 0 : index
    %4 = vector.load %arg3[%c0_3, %c0_4] : memref<1x128xf32, #tpu.memory_space<vmem>>, vector<1x128xf32>
    %5 = vector.broadcast %4 : vector<1x128xf32> to vector<8x128xf32>
    %6 = arith.addf %3, %5 : vector<8x128xf32>
    %cst_5 = arith.constant 0.000000e+00 : f32
    %7 = vector.broadcast %cst_5 : f32 to vector<8x128xf32>
    %8 = arith.maximumf %6, %7 : vector<8x128xf32>
    %9 = arith.truncf %8 : vector<8x128xf32> to vector<8x128xbf16>
    %c0_6 = arith.constant 0 : index
    %c0_7 = arith.constant 0 : index
    %10 = vector.load %arg4[%c0_6, %c0_7] : memref<128x256xbf16, #tpu.memory_space<vmem>>, vector<128x256xbf16>
    %cst_8 = arith.constant dense<0.000000e+00> : vector<8x256xf32>
    %11 = tpu.matmul %9, %10, %cst_8 {dimension_numbers = #tpu.dot_dimension_numbers<[1], [0], [0], [1], [0, 0, 1, 1], [], []>} : vector<8x128xbf16>, vector<128x256xbf16>, vector<8x256xf32> -> vector<8x256xf32>
    %c0_9 = arith.constant 0 : index
    %c0_10 = arith.constant 0 : index
    %12 = vector.load %arg5[%c0_9, %c0_10] : memref<1x256xf32, #tpu.memory_space<vmem>>, vector<1x256xf32>
    %13 = vector.broadcast %12 : vector<1x256xf32> to vector<8x256xf32>
    %14 = arith.addf %11, %13 : vector<8x256xf32>
    %15 = vector.extract_strided_slice %14 {offsets = [0, 0], sizes = [8, 128], strides = [1, 1]} : vector<8x256xf32> to vector<8x128xf32>
    %16 = vector.extract_strided_slice %14 {offsets = [0, 128], sizes = [8, 128], strides = [1, 1]} : vector<8x256xf32> to vector<8x128xf32>
    %cst_11 = arith.constant 5.000000e-01 : f32
    %17 = vector.broadcast %cst_11 : f32 to vector<8x128xf32>
    %18 = arith.mulf %17, %16 : vector<8x128xf32>
    %19 = math.exp %18 : vector<8x128xf32>
    %c0_12 = arith.constant 0 : index
    %c0_13 = arith.constant 0 : index
    %20 = vector.load %arg6[%c0_12, %c0_13] : memref<8x128xf32, #tpu.memory_space<vmem>>, vector<8x128xf32>
    %21 = arith.mulf %19, %20 : vector<8x128xf32>
    %22 = arith.addf %15, %21 : vector<8x128xf32>
    %23 = arith.truncf %22 : vector<8x128xf32> to vector<8x128xbf16>
    %c0_14 = arith.constant 0 : index
    %c0_15 = arith.constant 0 : index
    %24 = vector.load %arg7[%c0_14, %c0_15] : memref<128x128xbf16, #tpu.memory_space<vmem>>, vector<128x128xbf16>
    %cst_16 = arith.constant dense<0.000000e+00> : vector<8x128xf32>
    %25 = tpu.matmul %23, %24, %cst_16 {dimension_numbers = #tpu.dot_dimension_numbers<[1], [0], [0], [1], [0, 0, 1, 1], [], []>} : vector<8x128xbf16>, vector<128x128xbf16>, vector<8x128xf32> -> vector<8x128xf32>
    %c0_17 = arith.constant 0 : index
    %c0_18 = arith.constant 0 : index
    %26 = vector.load %arg8[%c0_17, %c0_18] : memref<1x128xf32, #tpu.memory_space<vmem>>, vector<1x128xf32>
    %27 = vector.broadcast %26 : vector<1x128xf32> to vector<8x128xf32>
    %28 = arith.addf %25, %27 : vector<8x128xf32>
    %cst_19 = arith.constant 0.000000e+00 : f32
    %29 = vector.broadcast %cst_19 : f32 to vector<8x128xf32>
    %30 = arith.maximumf %28, %29 : vector<8x128xf32>
    %31 = arith.truncf %30 : vector<8x128xf32> to vector<8x128xbf16>
    %c0_20 = arith.constant 0 : index
    %c0_21 = arith.constant 0 : index
    %32 = vector.load %arg9[%c0_20, %c0_21] : memref<128x1024xbf16, #tpu.memory_space<vmem>>, vector<128x1024xbf16>
    %cst_22 = arith.constant dense<0.000000e+00> : vector<8x1024xf32>
    %33 = tpu.matmul %31, %32, %cst_22 {dimension_numbers = #tpu.dot_dimension_numbers<[1], [0], [0], [1], [0, 0, 1, 1], [], []>} : vector<8x128xbf16>, vector<128x1024xbf16>, vector<8x1024xf32> -> vector<8x1024xf32>
    %c0_23 = arith.constant 0 : index
    %c0_24 = arith.constant 0 : index
    %34 = vector.load %arg10[%c0_23, %c0_24] : memref<1x1024xf32, #tpu.memory_space<vmem>>, vector<1x1024xf32>
    %35 = vector.broadcast %34 : vector<1x1024xf32> to vector<8x1024xf32>
    %36 = arith.addf %33, %35 : vector<8x1024xf32>
    %37 = arith.truncf %36 : vector<8x1024xf32> to vector<8x1024xbf16>
    %c0_25 = arith.constant 0 : index
    %c0_26 = arith.constant 0 : index
    %38 = vector.load %arg11[%c0_25, %c0_26] : memref<8x1024xbf16, #tpu.memory_space<vmem>>, vector<8x1024xbf16>
    tpu.vector_store %arg11[%c0_25, %c0_26], %37 {strides = array<i32>} : memref<8x1024xbf16, #tpu.memory_space<vmem>>, vector<8x1024xbf16>,
    %39 = arith.subf %0, %36 : vector<8x1024xf32>
    %40 = arith.mulf %39, %39 : vector<8x1024xf32>
    %cst_27 = arith.constant dense<0.000000e+00> : vector<8xf32>
    %41 = vector.multi_reduction <add>, %40, %cst_27 [1] : vector<8x1024xf32> to vector<8xf32>
    %42 = vector.shape_cast %41 : vector<8xf32> to vector<8x1xf32>
    %cst_28 = arith.constant 5.000000e-01 : f32
    %43 = vector.broadcast %cst_28 : f32 to vector<8x1xf32>
    %44 = arith.mulf %43, %42 : vector<8x1xf32>
    %cst_29 = arith.constant 940.993041 : f32
    %45 = vector.broadcast %cst_29 : f32 to vector<8x1xf32>
    %46 = arith.addf %45, %44 : vector<8x1xf32>
    %47 = arith.mulf %19, %19 : vector<8x128xf32>
    %48 = arith.mulf %15, %15 : vector<8x128xf32>
    %49 = arith.addf %48, %47 : vector<8x128xf32>
    %cst_30 = arith.constant 1.000000e+00 : f32
    %50 = vector.broadcast %cst_30 : f32 to vector<8x128xf32>
    %51 = arith.subf %49, %50 : vector<8x128xf32>
    %52 = arith.subf %51, %16 : vector<8x128xf32>
    %cst_31 = arith.constant dense<0.000000e+00> : vector<8xf32>
    %53 = vector.multi_reduction <add>, %52, %cst_31 [1] : vector<8x128xf32> to vector<8xf32>
    %54 = vector.shape_cast %53 : vector<8xf32> to vector<8x1xf32>
    %cst_32 = arith.constant 5.000000e-01 : f32
    %55 = vector.broadcast %cst_32 : f32 to vector<8x1xf32>
    %56 = arith.mulf %55, %54 : vector<8x1xf32>
    %57 = tpu.iota {dimensions = array<i32: 1>} : vector<8x128xi32>
    %c0_i32 = arith.constant 0 : i32
    %58 = vector.broadcast %c0_i32 : i32 to vector<8x128xi32>
    %59 = arith.cmpi eq, %57, %58 : vector<8x128xi32>
    %c1_i32 = arith.constant 1 : i32
    %60 = vector.broadcast %c1_i32 : i32 to vector<8x128xi32>
    %61 = arith.cmpi eq, %57, %60 : vector<8x128xi32>
    %cst_33 = arith.constant 0.000000e+00 : f32
    %62 = vector.shape_cast %56 : vector<8x1xf32> to vector<8x1xf32>
    %63 = vector.broadcast %62 : vector<8x1xf32> to vector<8x128xf32>
    %64 = vector.broadcast %cst_33 : f32 to vector<8x128xf32>
    %65 = arith.select %61, %63, %64 : vector<8x128xi1>, vector<8x128xf32>
    %66 = vector.shape_cast %46 : vector<8x1xf32> to vector<8x1xf32>
    %67 = vector.broadcast %66 : vector<8x1xf32> to vector<8x128xf32>
    %68 = arith.select %59, %67, %65 : vector<8x128xi1>, vector<8x128xf32>
    %c0_34 = arith.constant 0 : index
    %c0_35 = arith.constant 0 : index
    %69 = vector.load %arg12[%c0_34, %c0_35] : memref<8x128xf32, #tpu.memory_space<vmem>>, vector<8x128xf32>
    tpu.vector_store %arg12[%c0_34, %c0_35], %68 {strides = array<i32>} : memref<8x128xf32, #tpu.memory_space<vmem>>, vector<8x128xf32>,
    return
  }
  func.func @transform_0(%arg0: i32) -> (i32, i32) {
    %c0_i32 = arith.constant 0 : i32
    %c0_i32_0 = arith.constant 0 : i32
    return %arg0, %c0_i32 : i32, i32
  }
  func.func @transform_1(%arg0: i32) -> (i32, i32) {
    %c0_i32 = arith.constant 0 : i32
    %c0_i32_0 = arith.constant 0 : i32
    %c0_i32_1 = arith.constant 0 : i32
    return %c0_i32, %c0_i32_0 : i32, i32
  }
  func.func @transform_2(%arg0: i32) -> (i32, i32) {
    %c0_i32 = arith.constant 0 : i32
    %c0_i32_0 = arith.constant 0 : i32
    %c0_i32_1 = arith.constant 0 : i32
    return %c0_i32, %c0_i32_0 : i32, i32
  }
  func.func @transform_3(%arg0: i32) -> (i32, i32) {
    %c0_i32 = arith.constant 0 : i32
    %c0_i32_0 = arith.constant 0 : i32
    %c0_i32_1 = arith.constant 0 : i32
    return %c0_i32, %c0_i32_0 : i32, i32
  }
  func.func @transform_4(%arg0: i32) -> (i32, i32) {
    %c0_i32 = arith.constant 0 : i32
    %c0_i32_0 = arith.constant 0 : i32
    %c0_i32_1 = arith.constant 0 : i32
    return %c0_i32, %c0_i32_0 : i32, i32
  }
  func.func @transform_5(%arg0: i32) -> (i32, i32) {
    %c0_i32 = arith.constant 0 : i32
    %c0_i32_0 = arith.constant 0 : i32
    return %arg0, %c0_i32 : i32, i32
  }
  func.func @transform_6(%arg0: i32) -> (i32, i32) {
    %c0_i32 = arith.constant 0 : i32
    %c0_i32_0 = arith.constant 0 : i32
    %c0_i32_1 = arith.constant 0 : i32
    return %c0_i32, %c0_i32_0 : i32, i32
  }
  func.func @transform_7(%arg0: i32) -> (i32, i32) {
    %c0_i32 = arith.constant 0 : i32
    %c0_i32_0 = arith.constant 0 : i32
    %c0_i32_1 = arith.constant 0 : i32
    return %c0_i32, %c0_i32_0 : i32, i32
  }
  func.func @transform_8(%arg0: i32) -> (i32, i32) {
    %c0_i32 = arith.constant 0 : i32
    %c0_i32_0 = arith.constant 0 : i32
    %c0_i32_1 = arith.constant 0 : i32
    return %c0_i32, %c0_i32_0 : i32, i32
  }
  func.func @transform_9(%arg0: i32) -> (i32, i32) {
    %c0_i32 = arith.constant 0 : i32
    %c0_i32_0 = arith.constant 0 : i32
    %c0_i32_1 = arith.constant 0 : i32
    return %c0_i32, %c0_i32_0 : i32, i32
  }
  func.func @transform_10(%arg0: i32) -> (i32, i32) {
    %c0_i32 = arith.constant 0 : i32
    %c0_i32_0 = arith.constant 0 : i32
    return %arg0, %c0_i32 : i32, i32
  }
  func.func @transform_11(%arg0: i32) -> (i32, i32) {
    %c0_i32 = arith.constant 0 : i32
    %c0_i32_0 = arith.constant 0 : i32
    return %arg0, %c0_i32 : i32, i32
  }
}

module attributes {stable_mosaic.version = 11 : i64} {
  func.func @vae_forward_kernel(%arg0: i32, %arg1: memref<8x1024xf32, #tpu.memory_space<vmem>>, %arg2: memref<1024x128xbf16, #tpu.memory_space<vmem>>, %arg3: memref<1x128xf32, #tpu.memory_space<vmem>>, %arg4: memref<128x256xbf16, #tpu.memory_space<vmem>>, %arg5: memref<1x256xf32, #tpu.memory_space<vmem>>, %arg6: memref<8x128xf32, #tpu.memory_space<vmem>>, %arg7: memref<128x128xbf16, #tpu.memory_space<vmem>>, %arg8: memref<1x128xf32, #tpu.memory_space<vmem>>, %arg9: memref<128x1024xbf16, #tpu.memory_space<vmem>>, %arg10: memref<1x1024xf32, #tpu.memory_space<vmem>>, %arg11: memref<8x1024xbf16, #tpu.memory_space<vmem>>, %arg12: memref<8x128xf32, #tpu.memory_space<vmem>>) attributes {dimension_semantics = [#tpu.dimension_semantics<parallel>], iteration_bounds = array<i64: 1>, scalar_prefetch = 0 : i64, scratch_operands = 0 : i64, tpu.core_type = #tpu.core_type<tc>, window_params = [{transform_indices = @transform_0, window_bounds = array<i64: 8, 1024>}, {pipeline_mode = #tpu.pipeline_mode<synchronous>, transform_indices = @transform_1, window_bounds = array<i64: 1024, 128>}, {pipeline_mode = #tpu.pipeline_mode<synchronous>, transform_indices = @transform_2, window_bounds = array<i64: 1, 128>}, {pipeline_mode = #tpu.pipeline_mode<synchronous>, transform_indices = @transform_3, window_bounds = array<i64: 128, 256>}, {pipeline_mode = #tpu.pipeline_mode<synchronous>, transform_indices = @transform_4, window_bounds = array<i64: 1, 256>}, {transform_indices = @transform_5, window_bounds = array<i64: 8, 128>}, {pipeline_mode = #tpu.pipeline_mode<synchronous>, transform_indices = @transform_6, window_bounds = array<i64: 128, 128>}, {pipeline_mode = #tpu.pipeline_mode<synchronous>, transform_indices = @transform_7, window_bounds = array<i64: 1, 128>}, {pipeline_mode = #tpu.pipeline_mode<synchronous>, transform_indices = @transform_8, window_bounds = array<i64: 128, 1024>}, {pipeline_mode = #tpu.pipeline_mode<synchronous>, transform_indices = @transform_9, window_bounds = array<i64: 1, 1024>}, {transform_indices = @transform_10, window_bounds = array<i64: 8, 1024>}, {transform_indices = @transform_11, window_bounds = array<i64: 8, 128>}]} {
    %c0 = arith.constant 0 : index
    %c0_0 = arith.constant 0 : index
    %0 = vector.load %arg1[%c0, %c0_0] : memref<8x1024xf32, #tpu.memory_space<vmem>>, vector<8x1024xf32>
    %1 = arith.truncf %0 : vector<8x1024xf32> to vector<8x1024xbf16>
    %c0_1 = arith.constant 0 : index
    %c0_2 = arith.constant 0 : index
    %2 = vector.load %arg2[%c0_1, %c0_2] : memref<1024x128xbf16, #tpu.memory_space<vmem>>, vector<1024x128xbf16>
    %cst = arith.constant dense<0.000000e+00> : vector<8x128xf32>
    %3 = tpu.matmul %1, %2, %cst {dimension_numbers = #tpu.dot_dimension_numbers<[1], [0], [0], [1], [0, 0, 1, 1], [], []>} : vector<8x1024xbf16>, vector<1024x128xbf16>, vector<8x128xf32> -> vector<8x128xf32>
    %c0_3 = arith.constant 0 : index
    %c0_4 = arith.constant 0 : index
    %4 = vector.load %arg3[%c0_3, %c0_4] : memref<1x128xf32, #tpu.memory_space<vmem>>, vector<1x128xf32>
    %5 = vector.broadcast %4 : vector<1x128xf32> to vector<8x128xf32>
    %6 = arith.addf %3, %5 : vector<8x128xf32>
    %cst_5 = arith.constant 0.000000e+00 : f32
    %7 = vector.broadcast %cst_5 : f32 to vector<8x128xf32>
    %8 = arith.maximumf %6, %7 : vector<8x128xf32>
    %9 = arith.truncf %8 : vector<8x128xf32> to vector<8x128xbf16>
    %c0_6 = arith.constant 0 : index
    %c0_7 = arith.constant 0 : index
    %10 = vector.load %arg4[%c0_6, %c0_7] : memref<128x256xbf16, #tpu.memory_space<vmem>>, vector<128x256xbf16>
    %cst_8 = arith.constant dense<0.000000e+00> : vector<8x256xf32>
    %11 = tpu.matmul %9, %10, %cst_8 {dimension_numbers = #tpu.dot_dimension_numbers<[1], [0], [0], [1], [0, 0, 1, 1], [], []>} : vector<8x128xbf16>, vector<128x256xbf16>, vector<8x256xf32> -> vector<8x256xf32>
    %c0_9 = arith.constant 0 : index
    %c0_10 = arith.constant 0 : index
    %12 = vector.load %arg5[%c0_9, %c0_10] : memref<1x256xf32, #tpu.memory_space<vmem>>, vector<1x256xf32>
    %13 = vector.broadcast %12 : vector<1x256xf32> to vector<8x256xf32>
    %14 = arith.addf %11, %13 : vector<8x256xf32>
    %15 = vector.extract_strided_slice %14 {offsets = [0, 0], sizes = [8, 128], strides = [1, 1]} : vector<8x256xf32> to vector<8x128xf32>
    %16 = vector.extract_strided_slice %14 {offsets = [0, 128], sizes = [8, 128], strides = [1, 1]} : vector<8x256xf32> to vector<8x128xf32>
    %cst_11 = arith.constant 5.000000e-01 : f32
    %17 = vector.broadcast %cst_11 : f32 to vector<8x128xf32>
    %18 = arith.mulf %17, %16 : vector<8x128xf32>
    %19 = math.exp %18 : vector<8x128xf32>
    %c0_12 = arith.constant 0 : index
    %c0_13 = arith.constant 0 : index
    %20 = vector.load %arg6[%c0_12, %c0_13] : memref<8x128xf32, #tpu.memory_space<vmem>>, vector<8x128xf32>
    %21 = arith.mulf %19, %20 : vector<8x128xf32>
    %22 = arith.addf %15, %21 : vector<8x128xf32>
    %23 = arith.truncf %22 : vector<8x128xf32> to vector<8x128xbf16>
    %c0_14 = arith.constant 0 : index
    %c0_15 = arith.constant 0 : index
    %24 = vector.load %arg7[%c0_14, %c0_15] : memref<128x128xbf16, #tpu.memory_space<vmem>>, vector<128x128xbf16>
    %cst_16 = arith.constant dense<0.000000e+00> : vector<8x128xf32>
    %25 = tpu.matmul %23, %24, %cst_16 {dimension_numbers = #tpu.dot_dimension_numbers<[1], [0], [0], [1], [0, 0, 1, 1], [], []>} : vector<8x128xbf16>, vector<128x128xbf16>, vector<8x128xf32> -> vector<8x128xf32>
    %c0_17 = arith.constant 0 : index
    %c0_18 = arith.constant 0 : index
    %26 = vector.load %arg8[%c0_17, %c0_18] : memref<1x128xf32, #tpu.memory_space<vmem>>, vector<1x128xf32>
    %27 = vector.broadcast %26 : vector<1x128xf32> to vector<8x128xf32>
    %28 = arith.addf %25, %27 : vector<8x128xf32>
    %cst_19 = arith.constant 0.000000e+00 : f32
    %29 = vector.broadcast %cst_19 : f32 to vector<8x128xf32>
    %30 = arith.maximumf %28, %29 : vector<8x128xf32>
    %31 = arith.truncf %30 : vector<8x128xf32> to vector<8x128xbf16>
    %c0_20 = arith.constant 0 : index
    %c0_21 = arith.constant 0 : index
    %32 = vector.load %arg9[%c0_20, %c0_21] : memref<128x1024xbf16, #tpu.memory_space<vmem>>, vector<128x1024xbf16>
    %cst_22 = arith.constant dense<0.000000e+00> : vector<8x1024xf32>
    %33 = tpu.matmul %31, %32, %cst_22 {dimension_numbers = #tpu.dot_dimension_numbers<[1], [0], [0], [1], [0, 0, 1, 1], [], []>} : vector<8x128xbf16>, vector<128x1024xbf16>, vector<8x1024xf32> -> vector<8x1024xf32>
    %c0_23 = arith.constant 0 : index
    %c0_24 = arith.constant 0 : index
    %34 = vector.load %arg10[%c0_23, %c0_24] : memref<1x1024xf32, #tpu.memory_space<vmem>>, vector<1x1024xf32>
    %35 = vector.broadcast %34 : vector<1x1024xf32> to vector<8x1024xf32>
    %36 = arith.addf %33, %35 : vector<8x1024xf32>
    %37 = arith.truncf %36 : vector<8x1024xf32> to vector<8x1024xbf16>
    %c0_25 = arith.constant 0 : index
    %c0_26 = arith.constant 0 : index
    %38 = vector.load %arg11[%c0_25, %c0_26] : memref<8x1024xbf16, #tpu.memory_space<vmem>>, vector<8x1024xbf16>
    tpu.vector_store %arg11[%c0_25, %c0_26], %37 {strides = array<i32>} : memref<8x1024xbf16, #tpu.memory_space<vmem>>, vector<8x1024xbf16>,
    %39 = arith.subf %0, %36 : vector<8x1024xf32>
    %40 = arith.mulf %39, %39 : vector<8x1024xf32>
    %cst_27 = arith.constant dense<0.000000e+00> : vector<8xf32>
    %41 = vector.multi_reduction <add>, %40, %cst_27 [1] : vector<8x1024xf32> to vector<8xf32>
    %42 = vector.shape_cast %41 : vector<8xf32> to vector<8x1xf32>
    %cst_28 = arith.constant 5.000000e-01 : f32
    %43 = vector.broadcast %cst_28 : f32 to vector<8x1xf32>
    %44 = arith.mulf %43, %42 : vector<8x1xf32>
    %cst_29 = arith.constant 940.993041 : f32
    %45 = vector.broadcast %cst_29 : f32 to vector<8x1xf32>
    %46 = arith.addf %45, %44 : vector<8x1xf32>
    %47 = arith.mulf %19, %19 : vector<8x128xf32>
    %48 = arith.mulf %15, %15 : vector<8x128xf32>
    %49 = arith.addf %48, %47 : vector<8x128xf32>
    %cst_30 = arith.constant 1.000000e+00 : f32
    %50 = vector.broadcast %cst_30 : f32 to vector<8x128xf32>
    %51 = arith.subf %49, %50 : vector<8x128xf32>
    %52 = arith.subf %51, %16 : vector<8x128xf32>
    %cst_31 = arith.constant dense<0.000000e+00> : vector<8xf32>
    %53 = vector.multi_reduction <add>, %52, %cst_31 [1] : vector<8x128xf32> to vector<8xf32>
    %54 = vector.shape_cast %53 : vector<8xf32> to vector<8x1xf32>
    %cst_32 = arith.constant 5.000000e-01 : f32
    %55 = vector.broadcast %cst_32 : f32 to vector<8x1xf32>
    %56 = arith.mulf %55, %54 : vector<8x1xf32>
    %57 = tpu.iota {dimensions = array<i32: 1>} : vector<8x128xi32>
    %c0_i32 = arith.constant 0 : i32
    %58 = vector.broadcast %c0_i32 : i32 to vector<8x128xi32>
    %59 = arith.cmpi eq, %57, %58 : vector<8x128xi32>
    %c1_i32 = arith.constant 1 : i32
    %60 = vector.broadcast %c1_i32 : i32 to vector<8x128xi32>
    %61 = arith.cmpi eq, %57, %60 : vector<8x128xi32>
    %cst_33 = arith.constant 0.000000e+00 : f32
    %62 = vector.shape_cast %56 : vector<8x1xf32> to vector<8x1xf32>
    %63 = vector.broadcast %62 : vector<8x1xf32> to vector<8x128xf32>
    %64 = vector.broadcast %cst_33 : f32 to vector<8x128xf32>
    %65 = arith.select %61, %63, %64 : vector<8x128xi1>, vector<8x128xf32>
    %66 = vector.shape_cast %46 : vector<8x1xf32> to vector<8x1xf32>
    %67 = vector.broadcast %66 : vector<8x1xf32> to vector<8x128xf32>
    %68 = arith.select %59, %67, %65 : vector<8x128xi1>, vector<8x128xf32>
    %c0_34 = arith.constant 0 : index
    %c0_35 = arith.constant 0 : index
    %69 = vector.load %arg12[%c0_34, %c0_35] : memref<8x128xf32, #tpu.memory_space<vmem>>, vector<8x128xf32>
    tpu.vector_store %arg12[%c0_34, %c0_35], %68 {strides = array<i32>} : memref<8x128xf32, #tpu.memory_space<vmem>>, vector<8x128xf32>,
    return
  }
  func.func @transform_0(%arg0: i32) -> (i32, i32) {
    %c0_i32 = arith.constant 0 : i32
    %c0_i32_0 = arith.constant 0 : i32
    return %arg0, %c0_i32 : i32, i32
  }
  func.func @transform_1(%arg0: i32) -> (i32, i32) {
    %c0_i32 = arith.constant 0 : i32
    %c0_i32_0 = arith.constant 0 : i32
    %c0_i32_1 = arith.constant 0 : i32
    return %c0_i32, %c0_i32_0 : i32, i32
  }
  func.func @transform_2(%arg0: i32) -> (i32, i32) {
    %c0_i32 = arith.constant 0 : i32
    %c0_i32_0 = arith.constant 0 : i32
    %c0_i32_1 = arith.constant 0 : i32
    return %c0_i32, %c0_i32_0 : i32, i32
  }
  func.func @transform_3(%arg0: i32) -> (i32, i32) {
    %c0_i32 = arith.constant 0 : i32
    %c0_i32_0 = arith.constant 0 : i32
    %c0_i32_1 = arith.constant 0 : i32
    return %c0_i32, %c0_i32_0 : i32, i32
  }
  func.func @transform_4(%arg0: i32) -> (i32, i32) {
    %c0_i32 = arith.constant 0 : i32
    %c0_i32_0 = arith.constant 0 : i32
    %c0_i32_1 = arith.constant 0 : i32
    return %c0_i32, %c0_i32_0 : i32, i32
  }
  func.func @transform_5(%arg0: i32) -> (i32, i32) {
    %c0_i32 = arith.constant 0 : i32
    %c0_i32_0 = arith.constant 0 : i32
    return %arg0, %c0_i32 : i32, i32
  }
  func.func @transform_6(%arg0: i32) -> (i32, i32) {
    %c0_i32 = arith.constant 0 : i32
    %c0_i32_0 = arith.constant 0 : i32
    %c0_i32_1 = arith.constant 0 : i32
    return %c0_i32, %c0_i32_0 : i32, i32
  }
  func.func @transform_7(%arg0: i32) -> (i32, i32) {
    %c0_i32 = arith.constant 0 : i32
    %c0_i32_0 = arith.constant 0 : i32
    %c0_i32_1 = arith.constant 0 : i32
    return %c0_i32, %c0_i32_0 : i32, i32
  }
  func.func @transform_8(%arg0: i32) -> (i32, i32) {
    %c0_i32 = arith.constant 0 : i32
    %c0_i32_0 = arith.constant 0 : i32
    %c0_i32_1 = arith.constant 0 : i32
    return %c0_i32, %c0_i32_0 : i32, i32
  }
  func.func @transform_9(%arg0: i32) -> (i32, i32) {
    %c0_i32 = arith.constant 0 : i32
    %c0_i32_0 = arith.constant 0 : i32
    %c0_i32_1 = arith.constant 0 : i32
    return %c0_i32, %c0_i32_0 : i32, i32
  }
  func.func @transform_10(%arg0: i32) -> (i32, i32) {
    %c0_i32 = arith.constant 0 : i32
    %c0_i32_0 = arith.constant 0 : i32
    return %arg0, %c0_i32 : i32, i32
  }
  func.func @transform_11(%arg0: i32) -> (i32, i32) {
    %c0_i32 = arith.constant 0 : i32
    %c0_i32_0 = arith.constant 0 : i32
    return %arg0, %c0_i32 : i32, i32
  }
}

</mosaic_0001>

<bundles_post_ra>
// kernel: tpu_custom_call.1
= control target key start
LH: loop header
LB: loop body
LE: loop exit
PB: predicated region body
PF: predicated region fallthrough
CT: control target
= control target key end

     0   :  { %17 = vsyncpa [#allocation3], 0  ;;  %s2641_s0 = inlined_call_operand.hbm [shape: f32[8,1024], index: 0, kind: input, shape index: {}]   ;;  %s2642_s1 = inlined_call_operand.hbm [shape: bf16[1024,128], index: 1, kind: input, shape index: {}]   ;;  %s2643_s2 = inlined_call_operand.hbm [shape: f32[1,128], index: 2, kind: input, shape index: {}]   ;;  %s2644_s3 = inlined_call_operand.hbm [shape: bf16[128,256], index: 3, kind: input, shape index: {}]   ;;  %s2645_s4 = inlined_call_operand.vmem [shape: f32[1,256], index: 4, kind: input, shape index: {}]   ;;  %s2646_s5 = inlined_call_operand.vmem [shape: f32[8,128], index: 5, kind: input, shape index: {}]   ;;  %s2647_s6 = inlined_call_operand.hbm [shape: bf16[128,128], index: 6, kind: input, shape index: {}]   ;;  %s2648_s7 = inlined_call_operand.vmem [shape: f32[1,128], index: 7, kind: input, shape index: {}]   ;;  %s2649_s8 = inlined_call_operand.hbm [shape: bf16[128,1024], index: 8, kind: input, shape index: {}]   ;;  %s2650_s9 = inlined_call_operand.vmem [shape: f32[1,1024], index: 9, kind: input, shape index: {}]   ;;  %s2651_s10 = inlined_call_operand.hbm [shape: bf16[8,1024], index: 10, kind: output, shape index: {0}]   ;;  %s2652_s11 = inlined_call_operand.hbm [shape: f32[8,128], index: 11, kind: output, shape index: {1}]  }
   0x1   :  { %18 = vsyncpa [#allocation6], 0 }
   0x2   :  { %19 = vsyncpa [#allocation9], 0 }
   0x3   :  { %20 = vsyncpa [#allocation12], 0 }
   0x4   :  { %21 = vsyncpa [#allocation4], 0 }
   0x5   :  { %22 = vsyncpa [#allocation15], 0  ;;  %s2371_s17 = smov [#allocation5]   ;;  %s2183_s21 = scalar_lea.hbm %s2642_s1, 8192 }
   0x6   :  { %s38_s18 = sshll.u32 %s2371_s17, 4  ;;  %p2184_p0 = scmp.ne.s32.totalorder %s2642_s1, %s2183_s21  ;;  %s39_s18 = int_to_ptr.vmem [resolvable:$true] %s38_s18 }
   0x7   :  { %p2187_p1 = scmp.lt.u32.totalorder %s2183_s21, %s2642_s1 }
   0x9   :  { %p2189_p2 = pnand %p2187_p1, %p2184_p0 }
   0xb   :  { %2192 = shalt.err (!%p2189_p2)
}
   0xc   :  { %s2193_s26 = scalar_lea.vmem %s39_s18, 8192  ;;  %p2198_p4 = scmp.lt.s32.totalorder %s39_s18, %s39_s18 }
   0xd   :  { %p2194_p3 = scmp.ne.s32.totalorder %s39_s18, %s2193_s26  ;;  %p2199_p5 = scmp.lt.s32.totalorder %s2193_s26, %s2193_s26 }
   0xf   :  { %p2200_p6 = por %p2199_p5, %p2198_p4 }
  0x11   :  { %p2201_p7 = pnand %p2200_p6, %p2194_p3 }
  0x13   :  { %2204 = shalt.err (!%p2201_p7)
}
  0x14   :  { %s2372_s27 = smov 64   ;;  %s2373_s28 = smov 4  }
  0x15   :  { %44 = dma.hbm_to_vmem [thread:$0]  %s2642_s1, 8192, %s39_s18, [#allocation6], %s2372_s27, %s2372_s27, %s2373_s28  }
  0x16   :  { %s2374_s12 = smov [#allocation8]   ;;  %s2205_s16 = scalar_lea.hbm %s2644_s3, 2048 }
  0x17   :  { %s60_s13 = sshll.u32 %s2374_s12, 4  ;;  %p2206_p8 = scmp.ne.s32.totalorder %s2644_s3, %s2205_s16  ;;  %s61_s13 = int_to_ptr.vmem [resolvable:$true] %s60_s13 }
  0x18   :  { %p2209_p9 = scmp.lt.u32.totalorder %s2205_s16, %s2644_s3 }
  0x1a   :  { %p2211_p10 = pnand %p2209_p9, %p2206_p8 }
  0x1c   :  { %2214 = shalt.err (!%p2211_p10)
}
  0x1d   :  { %s2215_s22 = scalar_lea.vmem %s61_s13, 2048  ;;  %p2220_p12 = scmp.lt.s32.totalorder %s61_s13, %s61_s13 }
  0x1e   :  { %p2216_p11 = scmp.ne.s32.totalorder %s61_s13, %s2215_s22  ;;  %p2221_p13 = scmp.lt.s32.totalorder %s2215_s22, %s2215_s22 }
  0x20   :  { %p2222_p0 = por %p2221_p13, %p2220_p12 }
  0x22   :  { %p2223_p1 = pnand %p2222_p0, %p2216_p11 }
  0x24   :  { %2226 = shalt.err (!%p2223_p1)
}
  0x25   :  { %s2375_s1 = smov 128   ;;  %s2376_s18 = smov 8  }
  0x26   :  { %66 = dma.hbm_to_vmem [thread:$0]  %s2644_s3, 2048, %s61_s13, [#allocation9], %s2375_s1, %s2375_s1, %s2376_s18  }
  0x27   :  { %s2377_s25 = smov [#allocation2]   ;;  %s2378_s29 = smov [#allocation7]  }
  0x28   :  { %s29_s26 = sshll.u32 %s2377_s25, 4  ;;  %s51_s30 = sshll.u32 %s2378_s29, 4  ;;  %s30_s26 = int_to_ptr.vmem [resolvable:$true] %s29_s26  ;;  %s52_s30 = int_to_ptr.vmem [resolvable:$true] %s51_s30 }
  0x29   :  { %s2227_s15 = scalar_lea.hbm %s2641_s0, 1024 }
  0x2a   :  { %p2228_p2 = scmp.ne.s32.totalorder %s2641_s0, %s2227_s15  ;;  %p2231_p3 = scmp.lt.u32.totalorder %s2227_s15, %s2641_s0 }
  0x2c   :  { %p2233_p4 = pnand %p2231_p3, %p2228_p2 }
  0x2e   :  { %2236 = shalt.err (!%p2233_p4)
}
  0x2f   :  { %s2237_s3 = scalar_lea.vmem %s30_s26, 1024  ;;  %p2242_p6 = scmp.lt.s32.totalorder %s30_s26, %s30_s26 }
  0x30   :  { %p2238_p5 = scmp.ne.s32.totalorder %s30_s26, %s2237_s3  ;;  %p2243_p7 = scmp.lt.s32.totalorder %s2237_s3, %s2237_s3 }
  0x32   :  { %p2244_p8 = por %p2243_p7, %p2242_p6 }
  0x34   :  { %p2245_p9 = pnand %p2244_p8, %p2238_p5 }
  0x36   :  { %2248 = shalt.err (!%p2245_p9)
}
  0x37   :  { %32 = dma.hbm_to_vmem [thread:$0]  %s2641_s0, 1024, %s30_s26, [#allocation3]  }
  0x38   :  { %s2249_s18 = scalar_lea.hbm %s2643_s2, 16 }
  0x39   :  { %p2250_p10 = scmp.ne.s32.totalorder %s2643_s2, %s2249_s18  ;;  %p2253_p11 = scmp.lt.u32.totalorder %s2249_s18, %s2643_s2 }
  0x3b   :  { %p2255_p12 = pnand %p2253_p11, %p2250_p10 }
  0x3d   :  { %2258 = shalt.err (!%p2255_p12)
}
  0x3e   :  { %s2259_s12 = scalar_lea.vmem %s52_s30, 16  ;;  %s2263_s14 = scalar_lea.vmem %s52_s30, 32 }
  0x3f   :  { %p2260_p13 = scmp.ne.s32.totalorder %s52_s30, %s2259_s12  ;;  %p2264_p0 = scmp.lt.s32.totalorder %s52_s30, %s52_s30 }
  0x40   :  { %p2265_p1 = scmp.lt.s32.totalorder %s2263_s14, %s2259_s12 }
  0x42   :  { %p2266_p2 = por %p2265_p1, %p2264_p0 }
  0x44   :  { %p2267_p3 = pnand %p2266_p2, %p2260_p13 }
  0x46   :  { %2270 = shalt.err (!%p2267_p3)
}
  0x47   :  { %54 = dma.hbm_to_vmem [thread:$0]  %s2643_s2, 16, %s52_s30, [#allocation6]  }
  0x48   :  { %s2379_s15 = smov [#allocation10]   ;;  %s2380_s17 = smov [#allocation11]  }
  0x49   :  { %s76_s16 = sshll.u32 %s2379_s15, 4  ;;  %s90_s19 = sshll.u32 %s2380_s17, 4  ;;  %s77_s16 = int_to_ptr.vmem [resolvable:$true] %s76_s16  ;;  %s2499_s19 = int_to_ptr.vmem [resolvable:$true] %s90_s19 }
  0x4a   :  { %s2271_s13 = scalar_lea.hbm %s2647_s6, 1024 }
  0x4b   :  { %p2272_p4 = scmp.ne.s32.totalorder %s2647_s6, %s2271_s13  ;;  %p2275_p5 = scmp.lt.u32.totalorder %s2271_s13, %s2647_s6 }
  0x4d   :  { %p2277_p6 = pnand %p2275_p5, %p2272_p4 }
  0x4f   :  { %2280 = shalt.err (!%p2277_p6)
}
  0x50   :  { %s2281_s2 = scalar_lea.vmem %s77_s16, 1024  ;;  %p2286_p8 = scmp.lt.s32.totalorder %s77_s16, %s77_s16 }
  0x51   :  { %p2282_p7 = scmp.ne.s32.totalorder %s77_s16, %s2281_s2  ;;  %p2287_p9 = scmp.lt.s32.totalorder %s2281_s2, %s2281_s2 }
  0x53   :  { %p2288_p10 = por %p2287_p9, %p2286_p8 }
  0x55   :  { %p2289_p11 = pnand %p2288_p10, %p2282_p7 }
  0x57   :  { %2292 = shalt.err (!%p2289_p11)
}
  0x58   :  { %82 = dma.hbm_to_vmem [thread:$0]  %s2647_s6, 1024, %s77_s16, [#allocation9], %s2372_s27, %s2372_s27, %s2373_s28  }
  0x59   :  { %s2293_s29 = scalar_lea.hbm %s2649_s8, 8192 }
  0x5a   :  { %p2294_p12 = scmp.ne.s32.totalorder %s2649_s8, %s2293_s29  ;;  %p2297_p13 = scmp.lt.u32.totalorder %s2293_s29, %s2649_s8 }
  0x5c   :  { %p2299_p0 = pnand %p2297_p13, %p2294_p12 }
  0x5e   :  { %2302 = shalt.err (!%p2299_p0)
}
  0x5f   :  { %s2303_s15 = scalar_lea.vmem %s2499_s19, 8192  ;;  %p2308_p2 = scmp.lt.s32.totalorder %s2499_s19, %s2499_s19 }
  0x60   :  { %p2304_p1 = scmp.ne.s32.totalorder %s2499_s19, %s2303_s15  ;;  %p2309_p3 = scmp.lt.s32.totalorder %s2303_s15, %s2303_s15 }
  0x62   :  { %p2310_p4 = por %p2309_p3, %p2308_p2 }
  0x64   :  { %p2311_p5 = pnand %p2310_p4, %p2304_p1 }
  0x66   :  { %2314 = shalt.err (!%p2311_p5)
}
  0x67   :  { %s2381_s6 = smov 512   ;;  %s2382_s27 = smov 32  }
  0x68   :  { %96 = dma.hbm_to_vmem [thread:$0]  %s2649_s8, 8192, %s2499_s19, [#allocation12], %s2381_s6, %s2381_s6, %s2382_s27  }
  0x69   :  { %2359 = dma.done.wait [#allocation3], 1024  }
  0x6a   :  { %2360 = vsyncadd [#allocation3], 4294966272 }
  0x6b   :  { %2361 = dma.done.wait [#allocation6], 8208  }
  0x6c   :  { %2362 = vsyncadd [#allocation6], 4294959088 }
  0x6d   :  { %2363 = dma.done.wait [#allocation9], 3072  }
  0x6e   :  { %2364 = vsyncadd [#allocation9], 4294964224 }
  0x6f   :  { %2365 = dma.done.wait [#allocation12], 8192  }
  0x70   :  { %2366 = vsyncadd [#allocation12], 4294959104  ;;  %v2081_v0 = vld [vmem:[#allocation5 + $0x40] sm:$0xff]   ;;  %v2085_v4 = vld [vmem:[#allocation5 + $0x48] sm:$0xff]   ;;  %vm2385_vm0 = vmmov 0  }
  0x71   :  { %v2082_v1 = vld [vmem:[#allocation5 + $0xc0] sm:$0xff]   ;;  %1947 = vmatprep.subr.bf16.mxu0 %v2081_v0  ;;  %v2086_v5 = vld [vmem:[#allocation5 + $0xc8] sm:$0xff]   ;;  %v2089_v8 = vld [vmem:[#allocation5 + $0x50] sm:$0xff]  }
  0x72   :  { %v2083_v2 = vld [vmem:[#allocation5] sm:$0xff]   ;;  %1969 = vmatprep.subr.bf16.mxu1 %v2082_v1  ;;  %v2087_v6 = vld [vmem:[#allocation5 + $0x8] sm:$0xff]   ;;  %v2090_v9 = vld [vmem:[#allocation5 + $0xd0] sm:$0xff]  }
  0x73   :  { %v2084_v3 = vld [vmem:[#allocation5 + $0x80] sm:$0xff]   ;;  %1948 = vmatpush3.bf16.msra.mxu0 %v2083_v2  ;;  %v2088_v7 = vld [vmem:[#allocation5 + $0x88] sm:$0xff]   ;;  %v2091_v10 = vld [vmem:[#allocation5 + $0x10] sm:$0xff]  }
  0x74   :  { %1970 = vmatpush3.bf16.msra.mxu1 %v2084_v3  ;;  %1949 = vmatprep.subr.bf16.mxu0 %v2085_v4  ;;  %v2092_v11 = vld [vmem:[#allocation5 + $0x90] sm:$0xff]   ;;  %v2093_v12 = vld [vmem:[#allocation5 + $0x58] sm:$0xff]   ;;  %v2097_v16 = vld [vmem:[#allocation5 + $0x60] sm:$0xff]  }
  0x75   :  { %1971 = vmatprep.subr.bf16.mxu1 %v2086_v5  ;;  %v2094_v13 = vld [vmem:[#allocation5 + $0xd8] sm:$0xff]   ;;  %v2098_v17 = vld [vmem:[#allocation5 + $0xe0] sm:$0xff]   ;;  %v2101_v20 = vld [vmem:[#allocation5 + $0x68] sm:$0xff]  }
  0x76   :  { %v2095_v14 = vld [vmem:[#allocation5 + $0x18] sm:$0xff]   ;;  %v2099_v18 = vld [vmem:[#allocation5 + $0x20] sm:$0xff]   ;;  %v2102_v21 = vld [vmem:[#allocation5 + $0xe8] sm:$0xff]  }
  0x77   :  { %1950 = vmatpush3.bf16.msra.mxu0 %v2087_v6  ;;  %v2096_v15 = vld [vmem:[#allocation5 + $0x98] sm:$0xff]   ;;  %v2100_v19 = vld [vmem:[#allocation5 + $0xa0] sm:$0xff]   ;;  %v2103_v22 = vld [vmem:[#allocation5 + $0x28] sm:$0xff]  }
  0x78   :  { %1972 = vmatpush3.bf16.msra.mxu1 %v2088_v7  ;;  %1951 = vmatprep.subr.bf16.mxu0 %v2089_v8  ;;  %v2104_v23 = vld [vmem:[#allocation5 + $0xa8] sm:$0xff]   ;;  %v2105_v24 = vld [vmem:[#allocation5 + $0x70] sm:$0xff]   ;;  %v2109_v28 = vld [vmem:[#allocation5 + $0x78] sm:$0xff]  }
  0x79   :  { %1973 = vmatprep.subr.bf16.mxu1 %v2090_v9  ;;  %v2106_v25 = vld [vmem:[#allocation5 + $0xf0] sm:$0xff]   ;;  %v2110_v29 = vld [vmem:[#allocation5 + $0xf8] sm:$0xff]   ;;  %v119_v32 = vld [vmem:[#allocation2 + $0x8] sm:$0xff] }
  0x7a   :  { %v2107_v26 = vld [vmem:[#allocation5 + $0x30] sm:$0xff]   ;;  %v2111_v30 = vld [vmem:[#allocation5 + $0x38] sm:$0xff]   ;;  %v118_v34 = vld [vmem:[#allocation2] sm:$0xff]  ;;  %v127_v35 = vpack.c.bf16 %v119_v32, %v119_v32  ;;  %v2383_v32 = vmov 0  }
  0x7b   :  { %1952 = vmatpush3.bf16.msra.mxu0 %v2091_v10  ;;  %v2108_v27 = vld [vmem:[#allocation5 + $0xb0] sm:$0xff]   ;;  %v2112_v31 = vld [vmem:[#allocation5 + $0xb8] sm:$0xff]   ;;  %v126_v37 = vpack.c.bf16 %v118_v34, %v118_v34  ;;  %v2113_v40 = vld [vmem:[#allocation5 + $0x140] sm:$0xff]   ;;  %v2384_v34 = vmov 0.0  }
  0x7c   :  { %1974 = vmatpush3.bf16.msra.mxu1 %v2092_v11  ;;  %1953 = vmatprep.subr.bf16.mxu0 %v2093_v12  ;;  %v121_v33 = vld [vmem:[#allocation2 + $0x18] sm:$0xff]  ;;  %v120_v38 = vld [vmem:[#allocation2 + $0x10] sm:$0xff]  ;;  %v2114_v41 = vld [vmem:[#allocation5 + $0x1c0] sm:$0xff]  }
  0x7d   :  { %1975 = vmatprep.subr.bf16.mxu1 %v2094_v13  ;;  %v129_v36 = vpack.c.bf16 %v121_v33, %v121_v33  ;;  %v128_v39 = vpack.c.bf16 %v120_v38, %v120_v38  ;;  %685 = vmatprep.mubr.bf16.mxu0 %v127_v35  ;;  %v2115_v42 = vld [vmem:[#allocation5 + $0x100] sm:$0xff]   ;;  %v2117_v44 = vld [vmem:[#allocation5 + $0x148] sm:$0xff]   ;;  %v2121_v48 = vld [vmem:[#allocation5 + $0x150] sm:$0xff]  }
  0x7e   :  { %v2116_v43 = vld [vmem:[#allocation5 + $0x180] sm:$0xff]   ;;  %v2118_v45 = vld [vmem:[#allocation5 + $0x1c8] sm:$0xff]   ;;  %v2122_v49 = vld [vmem:[#allocation5 + $0x1d0] sm:$0xff]  }
  0x7f   :  { %1954 = vmatpush3.bf16.msra.mxu0 %v2095_v14  ;;  %725 = vmatprep.mubr.bf16.mxu1 %v129_v36  ;;  %v2119_v46 = vld [vmem:[#allocation5 + $0x108] sm:$0xff]   ;;  %v2123_v50 = vld [vmem:[#allocation5 + $0x110] sm:$0xff]   ;;  %v2125_v52 = vld [vmem:[#allocation5 + $0x158] sm:$0xff]  }
  0x80   :  { %1976 = vmatpush3.bf16.msra.mxu1 %v2096_v15  ;;  %1955 = vmatprep.subr.bf16.mxu0 %v2097_v16  ;;  %v2120_v47 = vld [vmem:[#allocation5 + $0x188] sm:$0xff]   ;;  %v2124_v51 = vld [vmem:[#allocation5 + $0x190] sm:$0xff]   ;;  %v2126_v53 = vld [vmem:[#allocation5 + $0x1d8] sm:$0xff]  }
  0x81   :  { %1977 = vmatprep.subr.bf16.mxu1 %v2098_v17  ;;  %v2127_v54 = vld [vmem:[#allocation5 + $0x118] sm:$0xff]   ;;  %v2129_v56 = vld [vmem:[#allocation5 + $0x160] sm:$0xff]   ;;  %v2133_v60 = vld [vmem:[#allocation5 + $0x168] sm:$0xff]  }
  0x82   :  { %v2128_v55 = vld [vmem:[#allocation5 + $0x198] sm:$0xff]   ;;  %v2130_v57 = vld [vmem:[#allocation5 + $0x1e0] sm:$0xff]   ;;  %v2134_v61 = vld [vmem:[#allocation5 + $0x1e8] sm:$0xff]  }
  0x83   :  { %1956 = vmatpush3.bf16.msra.mxu0 %v2099_v18  ;;  %v2131_v58 = vld [vmem:[#allocation5 + $0x120] sm:$0xff]   ;;  %v2135_v62 = vld [vmem:[#allocation5 + $0x128] sm:$0xff]   ;;  %v2137_v0 = vld [vmem:[#allocation5 + $0x170] sm:$0xff]  }
  0x84   :  { %1978 = vmatpush3.bf16.msra.mxu1 %v2100_v19  ;;  %1957 = vmatprep.subr.bf16.mxu0 %v2101_v20  ;;  %v2132_v59 = vld [vmem:[#allocation5 + $0x1a0] sm:$0xff]   ;;  %v2136_v63 = vld [vmem:[#allocation5 + $0x1a8] sm:$0xff]   ;;  %v2138_v1 = vld [vmem:[#allocation5 + $0x1f0] sm:$0xff]  }
  0x85   :  { %1979 = vmatprep.subr.bf16.mxu1 %v2102_v21  ;;  %v2139_v2 = vld [vmem:[#allocation5 + $0x130] sm:$0xff]   ;;  %v2141_v4 = vld [vmem:[#allocation5 + $0x178] sm:$0xff]   ;;  %v2533_v8 = vld [vmem:[#allocation2 + $0x28] sm:$0xff] }
  0x86   :  { %v2140_v3 = vld [vmem:[#allocation5 + $0x1b0] sm:$0xff]   ;;  %v2142_v5 = vld [vmem:[#allocation5 + $0x1f8] sm:$0xff]   ;;  %v131_v10 = vpack.c.bf16 %v2533_v8, %v2533_v8  ;;  %v2541_v12 = vld [vmem:[#allocation2 + $0x20] sm:$0xff] }
  0x87   :  { %1958 = vmatpush3.bf16.msra.mxu0 %v2103_v22  ;;  %v2143_v6 = vld [vmem:[#allocation5 + $0x138] sm:$0xff]   ;;  %v2543_v13 = vld [vmem:[#allocation2 + $0x30] sm:$0xff]  ;;  %v130_v14 = vpack.c.bf16 %v2541_v12, %v2541_v12  ;;  %v2145_v16 = vld [vmem:[#allocation8] ss:$8 sps:$4 sm:$0xff]  }
  0x88   :  { %1980 = vmatpush3.bf16.msra.mxu1 %v2104_v23  ;;  %1959 = vmatprep.subr.bf16.mxu0 %v2105_v24  ;;  %v2144_v7 = vld [vmem:[#allocation5 + $0x1b8] sm:$0xff]   ;;  %v132_v15 = vpack.c.bf16 %v2543_v13, %v2543_v13  ;;  %v2147_v17 = vld [vmem:[#allocation8 + $0x4] ss:$8 sps:$4 sm:$0xff]   ;;  %v2151_v21 = vld [vmem:[#allocation8 + $0x20] ss:$8 sps:$4 sm:$0xff]  }
  0x89   :  { %1981 = vmatprep.subr.bf16.mxu1 %v2106_v25  ;;  %v2535_v9 = vld [vmem:[#allocation2 + $0x38] sm:$0xff]  ;;  %v2153_v20 = vld [vmem:[#allocation8 + $0x24] ss:$8 sps:$4 sm:$0xff]   ;;  %v2157_v25 = vld [vmem:[#allocation8 + $0x40] ss:$8 sps:$4 sm:$0xff]  }
  0x8a   :  { %v133_v11 = vpack.c.bf16 %v2535_v9, %v2535_v9  ;;  %v2150_v18 = vld [vmem:[#allocation8 + $0x14] ss:$8 sps:$4 sm:$0xff]   ;;  %v2148_v19 = vld [vmem:[#allocation8 + $0x10] ss:$8 sps:$4 sm:$0xff]   ;;  %v2159_v24 = vld [vmem:[#allocation8 + $0x44] ss:$8 sps:$4 sm:$0xff]  }
  0x8b   :  { %1960 = vmatpush3.bf16.msra.mxu0 %v2107_v26  ;;  %v2156_v22 = vld [vmem:[#allocation8 + $0x34] ss:$8 sps:$4 sm:$0xff]   ;;  %v2154_v23 = vld [vmem:[#allocation8 + $0x30] ss:$8 sps:$4 sm:$0xff]   ;;  %v2169_v33 = vld [vmem:[#allocation10] sm:$0xff]  }
  0x8c   :  { %1982 = vmatpush3.bf16.msra.mxu1 %v2108_v27  ;;  %1961 = vmatprep.subr.bf16.mxu0 %v2109_v28  ;;  %v2162_v26 = vld [vmem:[#allocation8 + $0x54] ss:$8 sps:$4 sm:$0xff]   ;;  %v2160_v27 = vld [vmem:[#allocation8 + $0x50] ss:$8 sps:$4 sm:$0xff]   ;;  %v2165_v28 = vld [vmem:[#allocation8 + $0x64] ss:$8 sps:$4 sm:$0xff]  }
  0x8d   :  { %1983 = vmatprep.subr.bf16.mxu1 %v2110_v29  ;;  %v2163_v29 = vld [vmem:[#allocation8 + $0x60] ss:$8 sps:$4 sm:$0xff]   ;;  %v1784_v38 = vld [vmem:[#allocation7] ss:$0 sm:$0xff] }
  0x8e   :  { %v2170_v35 = vld [vmem:[#allocation10 + $0x8] sm:$0xff]  }
  0x8f   :  { %1962 = vmatpush3.bf16.msra.mxu0 %v2111_v30  ;;  %v2168_v30 = vld [vmem:[#allocation8 + $0x74] ss:$8 sps:$4 sm:$0xff]  }
  0x90   :  { %1984 = vmatpush3.bf16.msra.mxu1 %v2112_v31  ;;  %1991 = vmatprep.subr.bf16.mxu0 %v2113_v40  ;;  %v2166_v31 = vld [vmem:[#allocation8 + $0x70] ss:$8 sps:$4 sm:$0xff]  }
  0x91   :  { %2013 = vmatprep.subr.bf16.mxu1 %v2114_v41 }
  0x92   :  { %686 = vmatmul.mubr.bf16.vlgmr.msra.gmra.mrb[0].mxu0 %v126_v37 }
  0x93   :  { %726 = vmatmul.mubr.bf16.vlgmr.msra.gmra.mrb[0].mxu1 %v128_v39  ;;  %1992 = vmatpush3.bf16.msra.mxu0 %v2115_v42 }
  0x94   :  { %2014 = vmatpush3.bf16.msra.mxu1 %v2116_v43  ;;  %1993 = vmatprep.subr.bf16.mxu0 %v2117_v44 }
  0x95   :  { %2015 = vmatprep.subr.bf16.mxu1 %v2118_v45  ;;  %765 = vmatprep.mubr.bf16.mxu0 %v131_v10 }
  0x96   :  { %805 = vmatprep.mubr.bf16.mxu1 %v133_v11 }
  0x97   :  { %1994 = vmatpush3.bf16.msra.mxu0 %v2119_v46 }
  0x98   :  { %2016 = vmatpush3.bf16.msra.mxu1 %v2120_v47  ;;  %1995 = vmatprep.subr.bf16.mxu0 %v2121_v48 }
  0x99   :  { %2017 = vmatprep.subr.bf16.mxu1 %v2122_v49 }
  0x9b   :  { %1996 = vmatpush3.bf16.msra.mxu0 %v2123_v50 }
  0x9c   :  { %2018 = vmatpush3.bf16.msra.mxu1 %v2124_v51  ;;  %1997 = vmatprep.subr.bf16.mxu0 %v2125_v52 }
  0x9d   :  { %2019 = vmatprep.subr.bf16.mxu1 %v2126_v53 }
  0x9f   :  { %1998 = vmatpush3.bf16.msra.mxu0 %v2127_v54 }
  0xa0   :  { %2020 = vmatpush3.bf16.msra.mxu1 %v2128_v55  ;;  %1999 = vmatprep.subr.bf16.mxu0 %v2129_v56 }
  0xa1   :  { %2021 = vmatprep.subr.bf16.mxu1 %v2130_v57 }
  0xa3   :  { %2000 = vmatpush3.bf16.msra.mxu0 %v2131_v58 }
  0xa4   :  { %2022 = vmatpush3.bf16.msra.mxu1 %v2132_v59  ;;  %2001 = vmatprep.subr.bf16.mxu0 %v2133_v60 }
  0xa5   :  { %2023 = vmatprep.subr.bf16.mxu1 %v2134_v61 }
  0xa7   :  { %2002 = vmatpush3.bf16.msra.mxu0 %v2135_v62 }
  0xa8   :  { %2024 = vmatpush3.bf16.msra.mxu1 %v2136_v63  ;;  %2003 = vmatprep.subr.bf16.mxu0 %v2137_v0  ;;  %v2171_v63 = vld [vmem:[#allocation10 + $0x10] sm:$0xff]   ;;  %v2172_v0 = vld [vmem:[#allocation10 + $0x18] sm:$0xff]  }
  0xa9   :  { %2025 = vmatprep.subr.bf16.mxu1 %v2138_v1  ;;  %v2173_v1 = vld [vmem:[#allocation10 + $0x20] sm:$0xff]  }
  0xab   :  { %2004 = vmatpush3.bf16.msra.mxu0 %v2139_v2  ;;  %v2174_v2 = vld [vmem:[#allocation10 + $0x28] sm:$0xff]  }
  0xac   :  { %2026 = vmatpush3.bf16.msra.mxu1 %v2140_v3  ;;  %2005 = vmatprep.subr.bf16.mxu0 %v2141_v4  ;;  %v2175_v3 = vld [vmem:[#allocation10 + $0x30] sm:$0xff]   ;;  %v2176_v4 = vld [vmem:[#allocation10 + $0x38] sm:$0xff]  }
  0xad   :  { %2027 = vmatprep.subr.bf16.mxu1 %v2142_v5  ;;  %v1084_v5 = vld [vmem:[#allocation11] sm:$0xff] }
  0xaf   :  { %2006 = vmatpush3.bf16.msra.mxu0 %v2143_v6  ;;  %v1088_v6 = vld [vmem:[#allocation11 + $0x20] sm:$0xff] }
  0xb0   :  { %2028 = vmatpush3.bf16.msra.mxu1 %v2144_v7  ;;  %923 = vmatprep.subr.bf16.mxu0 %v2147_v17  ;;  %v2551_v7 = vld [vmem:[#allocation11 + $0x8] sm:$0xff]  ;;  %v1874_v10 = vcombine.low %v1084_v5, %v1088_v6  ;;  %v1875_v11 = vcombine.high %v1084_v5, %v1088_v6 }
  0xb1   :  { %2044 = vmatprep.subr.bf16.mxu1 %v2384_v34  ;;  %v1101_v5 = vld [vmem:[#allocation11 + $0x88] sm:$0xff] }
  0xb2   :  { %766 = vmatmul.mubr.bf16.vlgmr.msra.gmra.mrb[4].mxu0 %v130_v14  ;;  %v2553_v14 = vld [vmem:[#allocation11 + $0x28] sm:$0xff] }
  0xb3   :  { %806 = vmatmul.mubr.bf16.vlgmr.msra.gmra.mrb[4].mxu1 %v132_v15  ;;  %924 = vmatpush1.bf16.msra.mxu0 %v2145_v16  ;;  %v1092_v15 = vld [vmem:[#allocation11 + $0x40] sm:$0xff]  ;;  %v1876_v17 = vcombine.low %v2551_v7, %v2553_v14  ;;  %v1105_v6 = vld [vmem:[#allocation11 + $0xa8] sm:$0xff] }
  0xb4   :  { %925 = vmatprep.subr.bf16.mxu0 %v2150_v18  ;;  %955 = vmatprep.mubr.bf16.mxu0 %v2383_v32  ;;  %v1096_v16 = vld [vmem:[#allocation11 + $0x60] sm:$0xff]  ;;  %v1877_v18 = vcombine.high %v2551_v7, %v2553_v14  ;;  %v1129_v7 = vld [vmem:[#allocation11 + $0x168] sm:$0xff] }
  0xb5   :  { %2045 = vmatpush3.bf16.msra.mxu1 %v2169_v33  ;;  %2060 = vmatprep.mubr.msk.bf16.mxu1 %vm2385_vm0, %v2384_v34 }
  0xb6   :  { %2046 = vmatprep.subr.bf16.mxu1 %v2384_v34 }
  0xb7   :  { %926 = vmatpush1.bf16.msra.mxu0 %v2148_v19  ;;  %v1883_v19 = vcombine.high %v1092_v15, %v1096_v16 }
  0xb8   :  { %927 = vmatprep.subr.bf16.mxu0 %v2153_v20  ;;  %v1882_v20 = vcombine.low %v1092_v15, %v1096_v16  ;;  %v1893_v15 = vcombine.high %v1101_v5, %v1105_v6  ;;  %v1109_v16 = vld [vmem:[#allocation11 + $0xc8] sm:$0xff] }
  0xb9   :  { %2047 = vmatpush3.bf16.msra.mxu1 %v2170_v35  ;;  %v1128_v35 = vld [vmem:[#allocation11 + $0x160] sm:$0xff] }
  0xba   :  { %2048 = vmatprep.subr.bf16.mxu1 %v2384_v34 }
  0xbb   :  { %928 = vmatpush1.bf16.msra.mxu0 %v2151_v21  ;;  %v1100_v21 = vld [vmem:[#allocation11 + $0x80] sm:$0xff] }
  0xbc   :  { %929 = vmatprep.subr.bf16.mxu0 %v2156_v22  ;;  %v1104_v22 = vld [vmem:[#allocation11 + $0xa0] sm:$0xff] }
  0xbd   :  { %2049 = vmatpush3.bf16.msra.mxu1 %v2171_v63  ;;  %v1097_v63 = vld [vmem:[#allocation11 + $0x68] sm:$0xff] }
  0xbe   :  { %2050 = vmatprep.subr.bf16.mxu1 %v2384_v34 }
  0xbf   :  { %930 = vmatpush1.bf16.msra.mxu0 %v2154_v23  ;;  %v1891_v23 = vcombine.high %v1100_v21, %v1104_v22 }
  0xc0   :  { %931 = vmatprep.subr.bf16.mxu0 %v2159_v24  ;;  %v1890_v24 = vcombine.low %v1100_v21, %v1104_v22  ;;  %v1117_v21 = vld [vmem:[#allocation11 + $0x108] sm:$0xff] }
  0xc1   :  { %2051 = vmatpush3.bf16.msra.mxu1 %v2172_v0  ;;  %v1121_v22 = vld [vmem:[#allocation11 + $0x128] sm:$0xff] }
  0xc2   :  { %2052 = vmatprep.subr.bf16.mxu1 %v2384_v34  ;;  %v1908_v14 = vcombine.low %v1117_v21, %v1121_v22 }
  0xc3   :  { %932 = vmatpush1.bf16.msra.mxu0 %v2157_v25  ;;  %v1108_v25 = vld [vmem:[#allocation11 + $0xc0] sm:$0xff] }
  0xc4   :  { %933 = vmatprep.subr.bf16.mxu0 %v2162_v26  ;;  %v1112_v26 = vld [vmem:[#allocation11 + $0xe0] sm:$0xff] }
  0xc5   :  { %2053 = vmatpush3.bf16.msra.mxu1 %v2173_v1 }
  0xc6   :  { %2054 = vmatprep.subr.bf16.mxu1 %v2384_v34 }
  0xc7   :  { %934 = vmatpush1.bf16.msra.mxu0 %v2160_v27  ;;  %v1899_v27 = vcombine.high %v1108_v25, %v1112_v26 }
  0xc8   :  { %935 = vmatprep.subr.bf16.mxu0 %v2165_v28  ;;  %v1898_v28 = vcombine.low %v1108_v25, %v1112_v26  ;;  %v1125_v25 = vld [vmem:[#allocation11 + $0x148] sm:$0xff] }
  0xc9   :  { %2055 = vmatpush3.bf16.msra.mxu1 %v2174_v2  ;;  %v1133_v26 = vld [vmem:[#allocation11 + $0x188] sm:$0xff] }
  0xca   :  { %2056 = vmatprep.subr.bf16.mxu1 %v2384_v34 }
  0xcb   :  { %936 = vmatpush1.bf16.msra.mxu0 %v2163_v29  ;;  %v1116_v29 = vld [vmem:[#allocation11 + $0x100] sm:$0xff] }
  0xcc   :  { %937 = vmatprep.subr.bf16.mxu0 %v2168_v30  ;;  %v1120_v30 = vld [vmem:[#allocation11 + $0x120] sm:$0xff] }
  0xcd   :  { %2057 = vmatpush3.bf16.msra.mxu1 %v2175_v3  ;;  %v1906_v33 = vcombine.low %v1116_v29, %v1120_v30 }
  0xce   :  { %2058 = vmatprep.subr.bf16.mxu1 %v2384_v34  ;;  %v1124_v34 = vld [vmem:[#allocation11 + $0x140] sm:$0xff] }
  0xcf   :  { %938 = vmatpush1.bf16.msra.mxu0 %v2166_v31  ;;  %v1907_v31 = vcombine.high %v1116_v29, %v1120_v30 }
  0xd0   :  { %1510 = vmatprep.subr.bf16.mxu0 %v1875_v11 }
  0xd1   :  { %2059 = vmatpush3.bf16.msra.mxu1 %v2176_v4 }
  0xd2   :  { %1551 = vmatprep.subr.bf16.mxu1 %v1877_v18  ;;  %v1113_v18 = vld [vmem:[#allocation11 + $0xe8] sm:$0xff] }
 0x165   :  { %v1963_v36 = vpop.f32.mrb[0].mxu0 }
 0x166   :  { %v1985_v37 = vpop.f32.mrb[0].mxu1  ;;  %v1964_v39 = vpop.f32.mrb[1].mxu0 }
 0x167   :  { %v1986_v40 = vpop.f32.mrb[1].mxu1  ;;  %v1965_v41 = vadd.f32 %v1964_v39, %v1963_v36  ;;  %v1966_v43 = vpop.f32.mrb[2].mxu0  ;;  %v1915_v36 = vcombine.high %v1124_v34, %v1128_v35  ;;  %v1136_v39 = vld [vmem:[#allocation11 + $0x1a0] sm:$0xff] }
 0x168   :  { %v1987_v42 = vadd.f32 %v1986_v40, %v1985_v37  ;;  %v1988_v44 = vpop.f32.mrb[2].mxu1  ;;  %v1967_v45 = vpop.f32.mrb[3].mxu0  ;;  %v1914_v37 = vcombine.low %v1124_v34, %v1128_v35  ;;  %v1141_v34 = vld [vmem:[#allocation11 + $0x1c8] sm:$0xff] }
 0x169   :  { %v1989_v46 = vpop.f32.mrb[3].mxu1  ;;  %v688_v47 = vadd.f32 %v1965_v41, %v1784_v38  ;;  %v1132_v38 = vld [vmem:[#allocation11 + $0x180] sm:$0xff]  ;;  %v831_v45 = vld [vmem:[%s2645_s4] sm:$0x3] }
 0x16a   :  { %v1923_v40 = vcombine.high %v1132_v38, %v1136_v39  ;;  %v1922_v41 = vcombine.low %v1132_v38, %v1136_v39 }
 0x16b   :  { %v728_v48 = vadd.f32 %v1987_v42, %v688_v47  ;;  %v833_v42 = vlaneseq }
 0x16d   :  { %v2560_v43 = vshrl.u32 %v833_v42, 7 }
 0x16f   :  { %v839_v44 = vsub.s32 1, %v2560_v43 }
 0x171   :  { %v840_v46 = vrot.slane %v831_v45, %v839_v44 }
 0x185   :  { %v2007_v49 = vpop.f32.mrb[4].mxu0 }
 0x186   :  { %v2029_v50 = vpop.f32.mrb[4].mxu1  ;;  %v2008_v51 = vpop.f32.mrb[5].mxu0 }
 0x187   :  { %v2009_v52 = vadd.f32 %v2008_v51, %v2007_v49  ;;  %v2030_v53 = vpop.f32.mrb[5].mxu1  ;;  %v2010_v54 = vpop.f32.mrb[6].mxu0 }
 0x188   :  { %v2031_v55 = vadd.f32 %v2030_v53, %v2029_v50  ;;  %v2032_v56 = vpop.f32.mrb[6].mxu1  ;;  %v2011_v57 = vpop.f32.mrb[7].mxu0  ;;  %v835_v54 = vsub.s32 0, %v2560_v43 }
 0x189   :  { %v768_v58 = vadd.f32 %v2009_v52, %v728_v48  ;;  %v2033_v59 = vpop.f32.mrb[7].mxu1  ;;  %v967_v57 = vld [vmem:[%s2646_s5] sm:$0xff] }
 0x18b   :  { %v808_v60 = vadd.f32 %v2031_v55, %v768_v58  ;;  %v836_v55 = vrot.slane %v831_v45, %v835_v54  ;;  %v1087_v45 = vld [vmem:[#allocation11 + $0x18] sm:$0xff] }
 0x18d   :  { %v813_v61 = vmax.f32 %v808_v60, 0.0 }
 0x18f   :  { %v814_v62 = vpack.c.bf16 %v813_v61, %v813_v61 }
 0x191   :  { %956 = vmatmul.mubr.bf16.vlgmr.msra.gmra.mrb[8].mxu0 %v814_v62  ;;  %v1093_v62 = vld [vmem:[#allocation11 + $0x48] sm:$0xff] }
 0x192   :  { %1542 = vmatprep.mubr.bf16.mxu0 %v2383_v32  ;;  %1511 = vmatpush1.bf16.msra.mxu0 %v1874_v10  ;;  %v1885_v3 = vcombine.high %v1093_v62, %v1097_v63  ;;  %v1884_v11 = vcombine.low %v1093_v62, %v1097_v63 }
 0x193   :  { %1512 = vmatprep.subr.bf16.mxu0 %v1883_v19  ;;  %v1892_v19 = vcombine.low %v1101_v5, %v1105_v6  ;;  %v1106_v5 = vld [vmem:[#allocation11 + $0xb0] sm:$0xff]  ;;  %v1103_v6 = vld [vmem:[#allocation11 + $0x98] sm:$0xff] }
 0x196   :  { %1513 = vmatpush1.bf16.msra.mxu0 %v1882_v20  ;;  %v1901_v20 = vcombine.high %v1109_v16, %v1113_v18 }
 0x197   :  { %1514 = vmatprep.subr.bf16.mxu0 %v1891_v23  ;;  %v1900_v23 = vcombine.low %v1109_v16, %v1113_v18 }
 0x19a   :  { %1515 = vmatpush1.bf16.msra.mxu0 %v1890_v24  ;;  %v1909_v24 = vcombine.high %v1117_v21, %v1121_v22  ;;  %v1114_v21 = vld [vmem:[#allocation11 + $0xf0] sm:$0xff]  ;;  %v1111_v22 = vld [vmem:[#allocation11 + $0xd8] sm:$0xff] }
 0x19b   :  { %1516 = vmatprep.subr.bf16.mxu0 %v1899_v27  ;;  %v1137_v27 = vld [vmem:[#allocation11 + $0x1a8] sm:$0xff] }
 0x19c   :  { %v1925_v29 = vcombine.high %v1133_v26, %v1137_v27  ;;  %v1924_v30 = vcombine.low %v1133_v26, %v1137_v27  ;;  %v1122_v26 = vld [vmem:[#allocation11 + $0x130] sm:$0xff]  ;;  %v1119_v27 = vld [vmem:[#allocation11 + $0x118] sm:$0xff] }
 0x19e   :  { %1517 = vmatpush1.bf16.msra.mxu0 %v1898_v28  ;;  %v1916_v28 = vcombine.low %v1125_v25, %v1129_v7 }
 0x19f   :  { %1518 = vmatprep.subr.bf16.mxu0 %v1907_v31  ;;  %v1140_v31 = vld [vmem:[#allocation11 + $0x1c0] sm:$0xff] }
 0x1a2   :  { %1519 = vmatpush1.bf16.msra.mxu0 %v1906_v33  ;;  %v1144_v33 = vld [vmem:[#allocation11 + $0x1e0] sm:$0xff] }
 0x1a3   :  { %1520 = vmatprep.subr.bf16.mxu0 %v1915_v36  ;;  %v1931_v35 = vcombine.high %v1140_v31, %v1144_v33  ;;  %v1145_v36 = vld [vmem:[#allocation11 + $0x1e8] sm:$0xff] }
 0x1a4   :  { %v1932_v38 = vcombine.low %v1141_v34, %v1145_v36  ;;  %v1933_v39 = vcombine.high %v1141_v34, %v1145_v36  ;;  %v1130_v34 = vld [vmem:[#allocation11 + $0x170] sm:$0xff]  ;;  %v1131_v36 = vld [vmem:[#allocation11 + $0x178] sm:$0xff] }
 0x1a6   :  { %1521 = vmatpush1.bf16.msra.mxu0 %v1914_v37  ;;  %v1930_v37 = vcombine.low %v1140_v31, %v1144_v33  ;;  %v1126_v33 = vld [vmem:[#allocation11 + $0x150] sm:$0xff] }
 0x1a7   :  { %1522 = vmatprep.subr.bf16.mxu0 %v1923_v40  ;;  %v1086_v40 = vld [vmem:[#allocation11 + $0x10] sm:$0xff] }
 0x1aa   :  { %1523 = vmatpush1.bf16.msra.mxu0 %v1922_v41  ;;  %v1090_v41 = vld [vmem:[#allocation11 + $0x30] sm:$0xff] }
 0x1ab   :  { %1524 = vmatprep.subr.bf16.mxu0 %v1931_v35  ;;  %v1127_v35 = vld [vmem:[#allocation11 + $0x158] sm:$0xff] }
 0x1ae   :  { %1525 = vmatpush1.bf16.msra.mxu0 %v1930_v37 }
 0x264   :  { %v957_v47 = vpop.f32.mrb[8].mxu0 }
 0x265   :  { %v959_v48 = vpop.f32.mrb[9].mxu0  ;;  %v958_v56 = vadd.f32 %v957_v47, %v836_v55  ;;  %v1879_v47 = vcombine.high %v1086_v40, %v1090_v41 }
 0x266   :  { %v2568_v49 = vadd.f32 %v959_v48, %v840_v46  ;;  %v961_v50 = vpop.f32.mrb[10].mxu0  ;;  %v1878_v46 = vcombine.low %v1086_v40, %v1090_v41  ;;  %v1091_v48 = vld [vmem:[#allocation11 + $0x38] sm:$0xff]  ;;  %v1921_v40 = vcombine.high %v1127_v35, %v1131_v36  ;;  %v1134_v41 = vld [vmem:[#allocation11 + $0x190] sm:$0xff] }
 0x267   :  { %v962_v51 = vpop.f32.mrb[11].mxu0  ;;  %v1738_v59 = vmul.f32 %v958_v56, %v958_v56  ;;  %v1880_v50 = vcombine.low %v1087_v45, %v1091_v48  ;;  %1592 = vmatprep.subr.bf16.mxu0 %v1879_v47  ;;  %v1139_v47 = vld [vmem:[#allocation11 + $0x1b8] sm:$0xff] }
 0x268   :  { %v964_v52 = vmul.f32 0.5, %v2568_v49  ;;  %v1881_v51 = vcombine.high %v1087_v45, %v1091_v48  ;;  %v1138_v45 = vld [vmem:[#allocation11 + $0x1b0] sm:$0xff]  ;;  %v1918_v48 = vcombine.low %v1126_v33, %v1130_v34 }
 0x26a   :  { %v965_v53 = vmul.f32 1.442695, %v964_v52  ;;  %v1865_v52 = vld [vmem:[%s2648_s7] ss:$0 sm:$0xff] }
 0x26c   :  { %2177 = vpow2.f32 %v965_v53 }
 0x276   :  { %v2178_v58 = vpop.eup %2177 }
 0x277   :  { %v968_v60 = vmul.f32 %v2178_v58, %v967_v57  ;;  %v1737_v61 = vmul.f32 %v2178_v58, %v2178_v58  ;;  %v1094_v57 = vld [vmem:[#allocation11 + $0x50] sm:$0xff] }
 0x279   :  { %v969_v0 = vadd.f32 %v968_v60, %v958_v56  ;;  %v1739_v1 = vadd.f32 %v1738_v59, %v1737_v61  ;;  %v1098_v59 = vld [vmem:[#allocation11 + $0x70] sm:$0xff]  ;;  %v1095_v60 = vld [vmem:[#allocation11 + $0x58] sm:$0xff] }
 0x27a   :  { %v1099_v61 = vld [vmem:[#allocation11 + $0x78] sm:$0xff] }
 0x27b   :  { %v970_v2 = vpack.c.bf16 %v969_v0, %v969_v0  ;;  %v2577_v4 = vadd.f32 -1.0, %v1739_v1  ;;  %v1887_v1 = vcombine.high %v1094_v57, %v1098_v59  ;;  %v1888_v16 = vcombine.low %v1095_v60, %v1099_v61 }
 0x27d   :  { %2061 = vmatmul.mubr.bf16.vlgmr.msra.gmra.mrb[8].mxu1 %v970_v2  ;;  %v1741_v10 = vsub.f32 %v2577_v4, %v2568_v49  ;;  %v1889_v2 = vcombine.high %v1095_v60, %v1099_v61 }
 0x27e   :  { %1552 = vmatpush1.bf16.msra.mxu1 %v1876_v17  ;;  %1583 = vmatprep.mubr.bf16.mxu1 %v2383_v32  ;;  %v1917_v17 = vcombine.high %v1125_v25, %v1129_v7 }
 0x27f   :  { %1553 = vmatprep.subr.bf16.mxu1 %v1885_v3  ;;  %v1102_v3 = vld [vmem:[#allocation11 + $0x90] sm:$0xff] }
 0x280   :  { %v1895_v18 = vcombine.high %v1102_v3, %v1106_v5 }
 0x282   :  { %1554 = vmatpush1.bf16.msra.mxu1 %v1884_v11  ;;  %v1107_v11 = vld [vmem:[#allocation11 + $0xb8] sm:$0xff] }
 0x283   :  { %1555 = vmatprep.subr.bf16.mxu1 %v1893_v15  ;;  %v1886_v15 = vcombine.low %v1094_v57, %v1098_v59  ;;  %v1896_v25 = vcombine.low %v1103_v6, %v1107_v11  ;;  %v1147_v57 = vld [vmem:[#allocation11 + $0x1f8] sm:$0xff] }
 0x286   :  { %1556 = vmatpush1.bf16.msra.mxu1 %v1892_v19  ;;  %v1897_v19 = vcombine.high %v1103_v6, %v1107_v11 }
 0x287   :  { %1557 = vmatprep.subr.bf16.mxu1 %v1901_v20  ;;  %v1110_v20 = vld [vmem:[#allocation11 + $0xd0] sm:$0xff] }
 0x288   :  { %v1903_v7 = vcombine.high %v1110_v20, %v1114_v21 }
 0x28a   :  { %1558 = vmatpush1.bf16.msra.mxu1 %v1900_v23  ;;  %v1115_v23 = vld [vmem:[#allocation11 + $0xf8] sm:$0xff] }
 0x28b   :  { %1559 = vmatprep.subr.bf16.mxu1 %v1909_v24  ;;  %v1894_v24 = vcombine.low %v1102_v3, %v1106_v5  ;;  %v1164_v3 = vsub.s32 3, %v2560_v43 }
 0x28e   :  { %1560 = vmatpush1.bf16.msra.mxu1 %v1908_v14  ;;  %v1905_v14 = vcombine.high %v1111_v22, %v1115_v23 }
 0x28f   :  { %1561 = vmatprep.subr.bf16.mxu1 %v1917_v17  ;;  %v1118_v17 = vld [vmem:[#allocation11 + $0x110] sm:$0xff] }
 0x290   :  { %v1911_v31 = vcombine.high %v1118_v17, %v1122_v26  ;;  %v1910_v37 = vcombine.low %v1118_v17, %v1122_v26 }
 0x292   :  { %1562 = vmatpush1.bf16.msra.mxu1 %v1916_v28  ;;  %v1123_v28 = vld [vmem:[#allocation11 + $0x138] sm:$0xff] }
 0x293   :  { %1563 = vmatprep.subr.bf16.mxu1 %v1925_v29  ;;  %v1902_v29 = vcombine.low %v1110_v20, %v1114_v21 }
 0x296   :  { %1564 = vmatpush1.bf16.msra.mxu1 %v1924_v30  ;;  %v1904_v30 = vcombine.low %v1111_v22, %v1115_v23 }
 0x297   :  { %1565 = vmatprep.subr.bf16.mxu1 %v1933_v39  ;;  %v1919_v39 = vcombine.high %v1126_v33, %v1130_v34  ;;  %v2182_v33 = vld [vmem:[#allocation2 + $0x18] sm:$0xff] }
 0x29a   :  { %1566 = vmatpush1.bf16.msra.mxu1 %v1932_v38  ;;  %v1912_v38 = vcombine.low %v1119_v27, %v1123_v28 }
 0x29b   :  { %1633 = vmatprep.subr.bf16.mxu1 %v1881_v51  ;;  %v1927_v51 = vcombine.high %v1134_v41, %v1138_v45 }
 0x350   :  { %v1076_v53 = vpop.f32.mrb[8].mxu1 }
 0x351   :  { %v1077_v55 = vadd.f32 %v1865_v52, %v1076_v53  ;;  %v2062_v56 = vpop.f32.mrb[9].mxu1  ;;  %v1142_v53 = vld [vmem:[#allocation11 + $0x1d0] sm:$0xff] }
 0x352   :  { %v1079_v58 = vpop.f32.mrb[10].mxu1  ;;  %v1143_v56 = vld [vmem:[#allocation11 + $0x1d8] sm:$0xff] }
 0x353   :  { %v1082_v62 = vmax.f32 %v1077_v55, 0.0  ;;  %v2063_v63 = vpop.f32.mrb[11].mxu1  ;;  %v1146_v55 = vld [vmem:[#allocation11 + $0x1f0] sm:$0xff]  ;;  %v1926_v58 = vcombine.low %v1134_v41, %v1138_v45  ;;  %v1937_v61 = vcombine.high %v1143_v56, %v1147_v57  ;;  %v1176_v41 = vsub.s32 6, %v2560_v43 }
 0x354   :  { %v1935_v60 = vcombine.high %v1142_v53, %v1146_v55  ;;  %v1936_v63 = vcombine.low %v1143_v56, %v1147_v57  ;;  %v1172_v45 = vsub.s32 5, %v2560_v43 }
 0x355   :  { %v2588_v0 = vpack.c.bf16 %v1082_v62, %v1082_v62  ;;  %v1934_v62 = vcombine.low %v1142_v53, %v1146_v55 }
 0x357   :  { %1543 = vmatmul.mubr.bf16.vlgmr.msra.gmra.mrb[12].mxu0 %v2588_v0  ;;  %1584 = vmatmul.mubr.bf16.vlgmr.msra.gmra.mrb[12].mxu1 %v2588_v0 }
 0x358   :  { %1593 = vmatpush1.bf16.msra.mxu0 %v1878_v46  ;;  %1634 = vmatpush1.bf16.msra.mxu1 %v1880_v50  ;;  %v1135_v46 = vld [vmem:[#allocation11 + $0x198] sm:$0xff]  ;;  %v1920_v50 = vcombine.low %v1127_v35, %v1131_v36 }
 0x359   :  { %1594 = vmatprep.subr.bf16.mxu0 %v1887_v1  ;;  %1635 = vmatprep.subr.bf16.mxu1 %v1889_v2  ;;  %v1929_v52 = vcombine.high %v1135_v46, %v1139_v47  ;;  %v1928_v59 = vcombine.low %v1135_v46, %v1139_v47  ;;  %v1160_v1 = vsub.s32 2, %v2560_v43  ;;  %v1148_v2 = vld [vmem:[%s2650_s9] sm:$0xff]  ;;  %v1180_v46 = vsub.s32 7, %v2560_v43  ;;  %s2386_s9 = smov [#allocation13]  }
 0x35a   :  { %1624 = vmatprep.mubr.bf16.mxu0 %v2383_v32  ;;  %1665 = vmatprep.mubr.bf16.mxu1 %v2383_v32  ;;  %v1913_v32 = vcombine.high %v1119_v27, %v1123_v28  ;;  %v1153_v5 = vrot.slane %v1148_v2, %v835_v54  ;;  %v1157_v11 = vrot.slane %v1148_v2, %v839_v44  ;;  %v2180_v54 = vld [vmem:[#allocation2 + $0x10] sm:$0xff]  ;;  %s1758_s13 = sshll.u32 %s2386_s9, 4  ;;  %s1759_s13 = int_to_ptr.vmem [resolvable:$true] %s1758_s13 }
 0x35b   :  { %v1161_v6 = vrot.slane %v1148_v2, %v1160_v1  ;;  %s2315_s21 = scalar_lea.vmem %s1759_s13, 512  ;;  %p2320_p7 = scmp.lt.s32.totalorder %s1759_s13, %s1759_s13 }
 0x35c   :  { %1595 = vmatpush1.bf16.msra.mxu0 %v1886_v15  ;;  %1636 = vmatpush1.bf16.msra.mxu1 %v1888_v16  ;;  %v1165_v15 = vrot.slane %v1148_v2, %v1164_v3  ;;  %p2316_p6 = scmp.ne.s32.totalorder %s1759_s13, %s2315_s21  ;;  %p2321_p8 = scmp.lt.s32.totalorder %s2315_s21, %s2315_s21 }
 0x35d   :  { %1596 = vmatprep.subr.bf16.mxu0 %v1895_v18  ;;  %1637 = vmatprep.subr.bf16.mxu1 %v1897_v19 }
 0x35e   :  { %p2322_p9 = por %p2321_p8, %p2320_p7 }
 0x360   :  { %1597 = vmatpush1.bf16.msra.mxu0 %v1894_v24  ;;  %1638 = vmatpush1.bf16.msra.mxu1 %v1896_v25  ;;  %p2323_p10 = pnand %p2322_p9, %p2316_p6 }
 0x361   :  { %1598 = vmatprep.subr.bf16.mxu0 %v1903_v7  ;;  %1639 = vmatprep.subr.bf16.mxu1 %v1905_v14  ;;  %v2179_v7 = vld [vmem:[#allocation2] sm:$0xff] }
 0x364   :  { %1599 = vmatpush1.bf16.msra.mxu0 %v1902_v29  ;;  %1640 = vmatpush1.bf16.msra.mxu1 %v1904_v30  ;;  %v2181_v29 = vld [vmem:[#allocation2 + $0x8] sm:$0xff] }
 0x365   :  { %1600 = vmatprep.subr.bf16.mxu0 %v1911_v31  ;;  %1641 = vmatprep.subr.bf16.mxu1 %v1913_v32 }
 0x368   :  { %1601 = vmatpush1.bf16.msra.mxu0 %v1910_v37  ;;  %1642 = vmatpush1.bf16.msra.mxu1 %v1912_v38 }
 0x369   :  { %1602 = vmatprep.subr.bf16.mxu0 %v1919_v39  ;;  %1643 = vmatprep.subr.bf16.mxu1 %v1921_v40  ;;  %v1168_v40 = vsub.s32 4, %v2560_v43 }
 0x36b   :  { %v1169_v47 = vrot.slane %v1148_v2, %v1168_v40 }
 0x36c   :  { %1603 = vmatpush1.bf16.msra.mxu0 %v1918_v48  ;;  %1644 = vmatpush1.bf16.msra.mxu1 %v1920_v50  ;;  %v1177_v48 = vrot.slane %v1148_v2, %v1176_v41  ;;  %v1173_v50 = vrot.slane %v1148_v2, %v1172_v45 }
 0x36d   :  { %1604 = vmatprep.subr.bf16.mxu0 %v1927_v51  ;;  %1645 = vmatprep.subr.bf16.mxu1 %v1929_v52  ;;  %v1181_v51 = vrot.slane %v1148_v2, %v1180_v46 }
 0x370   :  { %1605 = vmatpush1.bf16.msra.mxu0 %v1926_v58  ;;  %1646 = vmatpush1.bf16.msra.mxu1 %v1928_v59 }
 0x371   :  { %1606 = vmatprep.subr.bf16.mxu0 %v1935_v60  ;;  %1647 = vmatprep.subr.bf16.mxu1 %v1937_v61 }
 0x374   :  { %1607 = vmatpush1.bf16.msra.mxu0 %v1934_v62  ;;  %1648 = vmatpush1.bf16.msra.mxu1 %v1936_v63 }
 0x377   :  { %1625 = vmatmul.mubr.bf16.vlgmr.msra.gmra.mrb[16].mxu0 %v2588_v0  ;;  %1666 = vmatmul.mubr.bf16.vlgmr.msra.gmra.mrb[16].mxu1 %v2588_v0 }
 0x42a   :  { %v1544_v16 = vpop.f32.mrb[12].mxu0  ;;  %v1585_v18 = vpop.f32.mrb[12].mxu1 }
 0x42b   :  { %v1545_v19 = vadd.f32 %v1544_v16, %v1153_v5  ;;  %v1586_v0 = vadd.f32 %v1585_v18, %v1161_v6  ;;  %v1546_v20 = vpop.f32.mrb[13].mxu0  ;;  %v1587_v21 = vpop.f32.mrb[13].mxu1 }
 0x42c   :  { %v1547_v22 = vadd.f32 %v1546_v20, %v1157_v11  ;;  %v1588_v23 = vadd.f32 %v1587_v21, %v1165_v15  ;;  %v1548_v24 = vpop.f32.mrb[14].mxu0  ;;  %v1589_v25 = vpop.f32.mrb[14].mxu1 }
 0x42d   :  { %v1710_v14 = vsub.f32 %v2179_v7, %v1545_v19  ;;  %v1549_v17 = vpop.f32.mrb[15].mxu0  ;;  %v1590_v26 = vpop.f32.mrb[15].mxu1  ;;  %v1712_v27 = vsub.f32 %v2180_v54, %v1586_v0 }
 0x42e   :  { %v1943_v28 = vpack.c.bf16 %v1547_v22, %v1545_v19  ;;  %v1711_v44 = vsub.f32 %v2181_v29, %v1547_v22  ;;  %v1944_v30 = vpack.c.bf16 %v1588_v23, %v1586_v0  ;;  %v1713_v34 = vsub.f32 %v2182_v33, %v1588_v23 }
 0x42f   :  { %v1718_v31 = vmul.f32 %v1710_v14, %v1710_v14  ;;  %v1720_v35 = vmul.f32 %v1712_v27, %v1712_v27 }
 0x430   :  { %1706 = vst [vmem:[#allocation13] sm:$0xff] %v1943_v28  ;;  %v1719_v32 = vmul.f32 %v1711_v44, %v1711_v44  ;;  %1707 = vst [vmem:[#allocation13 + $0x8] sm:$0xff] %v1944_v30  ;;  %v1721_v37 = vmul.f32 %v1713_v34, %v1713_v34 }
 0x432   :  { %v1726_v36 = vadd.f32 %v1719_v32, %v1718_v31 }
 0x434   :  { %v1727_v38 = vadd.f32 %v1726_v36, %v1720_v35 }
 0x436   :  { %v1728_v39 = vadd.f32 %v1727_v38, %v1721_v37 }
 0x44a   :  { %v1626_v52 = vpop.f32.mrb[16].mxu0  ;;  %v1667_v53 = vpop.f32.mrb[16].mxu1 }
 0x44b   :  { %v1627_v55 = vadd.f32 %v1626_v52, %v1169_v47  ;;  %v1668_v56 = vadd.f32 %v1667_v53, %v1177_v48  ;;  %v1628_v57 = vpop.f32.mrb[17].mxu0  ;;  %v1669_v58 = vpop.f32.mrb[17].mxu1 }
 0x44c   :  { %v1629_v59 = vadd.f32 %v1628_v57, %v1173_v50  ;;  %v1670_v60 = vadd.f32 %v1669_v58, %v1181_v51  ;;  %v1630_v61 = vpop.f32.mrb[18].mxu0  ;;  %v1671_v62 = vpop.f32.mrb[18].mxu1 }
 0x44d   :  { %v1714_v63 = vsub.f32 %v2541_v12, %v1627_v55  ;;  %v1631_v1 = vpop.f32.mrb[19].mxu0  ;;  %v1672_v3 = vpop.f32.mrb[19].mxu1  ;;  %v1716_v2 = vsub.f32 %v2543_v13, %v1668_v56 }
 0x44e   :  { %v1945_v5 = vpack.c.bf16 %v1629_v59, %v1627_v55  ;;  %v1715_v43 = vsub.f32 %v2533_v8, %v1629_v59  ;;  %v1946_v6 = vpack.c.bf16 %v1670_v60, %v1668_v56  ;;  %v1717_v18 = vsub.f32 %v2535_v9, %v1670_v60 }
 0x44f   :  { %v1722_v11 = vmul.f32 %v1714_v63, %v1714_v63  ;;  %v1724_v19 = vmul.f32 %v1716_v2, %v1716_v2 }
 0x450   :  { %1708 = vst [vmem:[#allocation13 + $0x10] sm:$0xff] %v1945_v5  ;;  %v1723_v15 = vmul.f32 %v1715_v43, %v1715_v43  ;;  %1709 = vst [vmem:[#allocation13 + $0x18] sm:$0xff] %v1946_v6  ;;  %v1725_v20 = vmul.f32 %v1717_v18, %v1717_v18 }
 0x451   :  { %v1729_v16 = vadd.f32 %v1728_v39, %v1722_v11 }
 0x453   :  { %v1730_v0 = vadd.f32 %v1729_v16, %v1723_v15 }
 0x455   :  { %v1731_v21 = vadd.f32 %v1730_v0, %v1724_v19 }
 0x457   :  { %v1732_v12 = vadd.f32 %v1731_v21, %v1725_v20 }
 0x459   :  { %1733 = vadd.xlane.f32.xlu0 %v1732_v12 }
 0x45d   :  { %1742 = vadd.xlane.f32.xlu0 %v1741_v10 }
 0x45e   :  { %2326 = shalt.err (!%p2323_p10)
}
 0x45f   :  { %s2327_s18 = scalar_lea.hbm %s2651_s10, 512 }
 0x460   :  { %p2328_p11 = scmp.ne.s32.totalorder %s2651_s10, %s2327_s18  ;;  %p2331_p12 = scmp.lt.u32.totalorder %s2327_s18, %s2651_s10 }
 0x462   :  { %p2333_p13 = pnand %p2331_p12, %p2328_p11 }
 0x464   :  { %2336 = shalt.err (!%p2333_p13)
}
 0x465   :  { %1761 = dma.vmem_to_hbm [thread:$0]  %s1759_s13, 512, %s2651_s10, [#allocation4]   ;;  %v1746_v9 = vand.u32 127, %v833_v42 }
 0x466   :  { %s2387_s12 = smov [#allocation14]  }
 0x467   :  { %vm1748_vm1 = vcmp.eq.s32.totalorder %v1746_v9, 1  ;;  %s1768_s14 = sshll.u32 %s2387_s12, 4  ;;  %vm1747_vm2 = vcmp.eq.s32.totalorder %v1746_v9, 0  ;;  %s1769_s14 = int_to_ptr.vmem [resolvable:$true] %s1768_s14 }
 0x468   :  { %s2337_s0 = scalar_lea.vmem %s1769_s14, 128  ;;  %p2342_p1 = scmp.lt.s32.totalorder %s1769_s14, %s1769_s14 }
 0x469   :  { %p2338_p0 = scmp.ne.s32.totalorder %s1769_s14, %s2337_s0  ;;  %p2343_p2 = scmp.lt.s32.totalorder %s2337_s0, %s2337_s0 }
 0x46b   :  { %p2344_p3 = por %p2343_p2, %p2342_p1 }
 0x46d   :  { %p2345_p4 = pnand %p2344_p3, %p2338_p0 }
 0x4e6   :  { %v1734_v8 = vpop.xlane.xlu0 %1733 }
 0x4e7   :  { %v1735_v13 = vmul.f32 0.5, %v1734_v8 }
 0x4e9   :  { %v1736_v10 = vadd.f32 940.99304, %v1735_v13 }
 0x4ea   :  { %v1743_v49 = vpop.xlane.xlu0 %1742 }
 0x4eb   :  { %v1744_v4 = vmul.f32 0.5, %v1743_v49 }
 0x4ed   :  { %v1749_v22 = vsel %vm1748_vm1, %v1744_v4, 0.0 }
 0x4ee   :  { %v1750_v23 = vsel %vm1747_vm2, %v1736_v10, %v1749_v22 }
 0x4ef   :  { %1751 = vst [vmem:[#allocation14] sm:$0xff] %v1750_v23 }
 0x4f0   :  { %2348 = shalt.err (!%p2345_p4)
}
 0x4f1   :  { %s2349_s15 = scalar_lea.hbm %s2652_s11, 128 }
 0x4f2   :  { %p2350_p5 = scmp.ne.s32.totalorder %s2652_s11, %s2349_s15  ;;  %p2353_p6 = scmp.lt.u32.totalorder %s2349_s15, %s2652_s11 }
 0x4f4   :  { %p2355_p7 = pnand %p2353_p6, %p2350_p5 }
 0x4f6   :  { %2358 = shalt.err (!%p2355_p7)
}
 0x4f7   :  { %1771 = dma.vmem_to_hbm [thread:$0]  %s1769_s14, 128, %s2652_s11, [#allocation15]  }
 0x4f8   :  { %2367 = dma.done.wait [#allocation4], 512  }
 0x4f9   :  { %2368 = vsyncadd [#allocation4], 4294966784 }
 0x4fa   :  { %2369 = dma.done.wait [#allocation15], 128  }
 0x4fb   :  { %2370 = vsyncadd [#allocation15], 4294967168 }
 0x4fc   :  { %1778 = vsyncpa [#allocation3], 1 }
 0x4fd   :  { %1779 = vsyncpa [#allocation6], 1 }
 0x4fe   :  { %1780 = vsyncpa [#allocation9], 1 }
 0x4ff   :  { %1781 = vsyncpa [#allocation12], 1 }
 0x500   :  { %1782 = vsyncpa [#allocation4], 1 }
 0x501   :  { %1783 = vsyncpa [#allocation15], 1 }

// kernel: tpu_custom_call.1
= control target key start
LH: loop header
LB: loop body
LE: loop exit
PB: predicated region body
PF: predicated region fallthrough
CT: control target
= control target key end

     0   :  { %17 = vsyncpa [#allocation3], 0  ;;  %s2641_s0 = inlined_call_operand.hbm [shape: f32[8,1024], index: 0, kind: input, shape index: {}]   ;;  %s2642_s1 = inlined_call_operand.hbm [shape: bf16[1024,128], index: 1, kind: input, shape index: {}]   ;;  %s2643_s2 = inlined_call_operand.hbm [shape: f32[1,128], index: 2, kind: input, shape index: {}]   ;;  %s2644_s3 = inlined_call_operand.hbm [shape: bf16[128,256], index: 3, kind: input, shape index: {}]   ;;  %s2645_s4 = inlined_call_operand.vmem [shape: f32[1,256], index: 4, kind: input, shape index: {}]   ;;  %s2646_s5 = inlined_call_operand.vmem [shape: f32[8,128], index: 5, kind: input, shape index: {}]   ;;  %s2647_s6 = inlined_call_operand.hbm [shape: bf16[128,128], index: 6, kind: input, shape index: {}]   ;;  %s2648_s7 = inlined_call_operand.vmem [shape: f32[1,128], index: 7, kind: input, shape index: {}]   ;;  %s2649_s8 = inlined_call_operand.hbm [shape: bf16[128,1024], index: 8, kind: input, shape index: {}]   ;;  %s2650_s9 = inlined_call_operand.vmem [shape: f32[1,1024], index: 9, kind: input, shape index: {}]   ;;  %s2651_s10 = inlined_call_operand.hbm [shape: bf16[8,1024], index: 10, kind: output, shape index: {0}]   ;;  %s2652_s11 = inlined_call_operand.hbm [shape: f32[8,128], index: 11, kind: output, shape index: {1}]  }
   0x1   :  { %18 = vsyncpa [#allocation6], 0 }
   0x2   :  { %19 = vsyncpa [#allocation9], 0 }
   0x3   :  { %20 = vsyncpa [#allocation12], 0 }
   0x4   :  { %21 = vsyncpa [#allocation4], 0 }
   0x5   :  { %22 = vsyncpa [#allocation15], 0  ;;  %s2371_s17 = smov [#allocation5]   ;;  %s2183_s21 = scalar_lea.hbm %s2642_s1, 8192 }
   0x6   :  { %s38_s18 = sshll.u32 %s2371_s17, 4  ;;  %p2184_p0 = scmp.ne.s32.totalorder %s2642_s1, %s2183_s21  ;;  %s39_s18 = int_to_ptr.vmem [resolvable:$true] %s38_s18 }
   0x7   :  { %p2187_p1 = scmp.lt.u32.totalorder %s2183_s21, %s2642_s1 }
   0x9   :  { %p2189_p2 = pnand %p2187_p1, %p2184_p0 }
   0xb   :  { %2192 = shalt.err (!%p2189_p2)
}
   0xc   :  { %s2193_s26 = scalar_lea.vmem %s39_s18, 8192  ;;  %p2198_p4 = scmp.lt.s32.totalorder %s39_s18, %s39_s18 }
   0xd   :  { %p2194_p3 = scmp.ne.s32.totalorder %s39_s18, %s2193_s26  ;;  %p2199_p5 = scmp.lt.s32.totalorder %s2193_s26, %s2193_s26 }
   0xf   :  { %p2200_p6 = por %p2199_p5, %p2198_p4 }
  0x11   :  { %p2201_p7 = pnand %p2200_p6, %p2194_p3 }
  0x13   :  { %2204 = shalt.err (!%p2201_p7)
}
  0x14   :  { %s2372_s27 = smov 64   ;;  %s2373_s28 = smov 4  }
  0x15   :  { %44 = dma.hbm_to_vmem [thread:$0]  %s2642_s1, 8192, %s39_s18, [#allocation6], %s2372_s27, %s2372_s27, %s2373_s28  }
  0x16   :  { %s2374_s12 = smov [#allocation8]   ;;  %s2205_s16 = scalar_lea.hbm %s2644_s3, 2048 }
  0x17   :  { %s60_s13 = sshll.u32 %s2374_s12, 4  ;;  %p2206_p8 = scmp.ne.s32.totalorder %s2644_s3, %s2205_s16  ;;  %s61_s13 = int_to_ptr.vmem [resolvable:$true] %s60_s13 }
  0x18   :  { %p2209_p9 = scmp.lt.u32.totalorder %s2205_s16, %s2644_s3 }
  0x1a   :  { %p2211_p10 = pnand %p2209_p9, %p2206_p8 }
  0x1c   :  { %2214 = shalt.err (!%p2211_p10)
}
  0x1d   :  { %s2215_s22 = scalar_lea.vmem %s61_s13, 2048  ;;  %p2220_p12 = scmp.lt.s32.totalorder %s61_s13, %s61_s13 }
  0x1e   :  { %p2216_p11 = scmp.ne.s32.totalorder %s61_s13, %s2215_s22  ;;  %p2221_p13 = scmp.lt.s32.totalorder %s2215_s22, %s2215_s22 }
  0x20   :  { %p2222_p0 = por %p2221_p13, %p2220_p12 }
  0x22   :  { %p2223_p1 = pnand %p2222_p0, %p2216_p11 }
  0x24   :  { %2226 = shalt.err (!%p2223_p1)
}
  0x25   :  { %s2375_s1 = smov 128   ;;  %s2376_s18 = smov 8  }
  0x26   :  { %66 = dma.hbm_to_vmem [thread:$0]  %s2644_s3, 2048, %s61_s13, [#allocation9], %s2375_s1, %s2375_s1, %s2376_s18  }
  0x27   :  { %s2377_s25 = smov [#allocation2]   ;;  %s2378_s29 = smov [#allocation7]  }
  0x28   :  { %s29_s26 = sshll.u32 %s2377_s25, 4  ;;  %s51_s30 = sshll.u32 %s2378_s29, 4  ;;  %s30_s26 = int_to_ptr.vmem [resolvable:$true] %s29_s26  ;;  %s52_s30 = int_to_ptr.vmem [resolvable:$true] %s51_s30 }
  0x29   :  { %s2227_s15 = scalar_lea.hbm %s2641_s0, 1024 }
  0x2a   :  { %p2228_p2 = scmp.ne.s32.totalorder %s2641_s0, %s2227_s15  ;;  %p2231_p3 = scmp.lt.u32.totalorder %s2227_s15, %s2641_s0 }
  0x2c   :  { %p2233_p4 = pnand %p2231_p3, %p2228_p2 }
  0x2e   :  { %2236 = shalt.err (!%p2233_p4)
}
  0x2f   :  { %s2237_s3 = scalar_lea.vmem %s30_s26, 1024  ;;  %p2242_p6 = scmp.lt.s32.totalorder %s30_s26, %s30_s26 }
  0x30   :  { %p2238_p5 = scmp.ne.s32.totalorder %s30_s26, %s2237_s3  ;;  %p2243_p7 = scmp.lt.s32.totalorder %s2237_s3, %s2237_s3 }
  0x32   :  { %p2244_p8 = por %p2243_p7, %p2242_p6 }
  0x34   :  { %p2245_p9 = pnand %p2244_p8, %p2238_p5 }
  0x36   :  { %2248 = shalt.err (!%p2245_p9)
}
  0x37   :  { %32 = dma.hbm_to_vmem [thread:$0]  %s2641_s0, 1024, %s30_s26, [#allocation3]  }
  0x38   :  { %s2249_s18 = scalar_lea.hbm %s2643_s2, 16 }
  0x39   :  { %p2250_p10 = scmp.ne.s32.totalorder %s2643_s2, %s2249_s18  ;;  %p2253_p11 = scmp.lt.u32.totalorder %s2249_s18, %s2643_s2 }
  0x3b   :  { %p2255_p12 = pnand %p2253_p11, %p2250_p10 }
  0x3d   :  { %2258 = shalt.err (!%p2255_p12)
}
  0x3e   :  { %s2259_s12 = scalar_lea.vmem %s52_s30, 16  ;;  %s2263_s14 = scalar_lea.vmem %s52_s30, 32 }
  0x3f   :  { %p2260_p13 = scmp.ne.s32.totalorder %s52_s30, %s2259_s12  ;;  %p2264_p0 = scmp.lt.s32.totalorder %s52_s30, %s52_s30 }
  0x40   :  { %p2265_p1 = scmp.lt.s32.totalorder %s2263_s14, %s2259_s12 }
  0x42   :  { %p2266_p2 = por %p2265_p1, %p2264_p0 }
  0x44   :  { %p2267_p3 = pnand %p2266_p2, %p2260_p13 }
  0x46   :  { %2270 = shalt.err (!%p2267_p3)
}
  0x47   :  { %54 = dma.hbm_to_vmem [thread:$0]  %s2643_s2, 16, %s52_s30, [#allocation6]  }
  0x48   :  { %s2379_s15 = smov [#allocation10]   ;;  %s2380_s17 = smov [#allocation11]  }
  0x49   :  { %s76_s16 = sshll.u32 %s2379_s15, 4  ;;  %s90_s19 = sshll.u32 %s2380_s17, 4  ;;  %s77_s16 = int_to_ptr.vmem [resolvable:$true] %s76_s16  ;;  %s2499_s19 = int_to_ptr.vmem [resolvable:$true] %s90_s19 }
  0x4a   :  { %s2271_s13 = scalar_lea.hbm %s2647_s6, 1024 }
  0x4b   :  { %p2272_p4 = scmp.ne.s32.totalorder %s2647_s6, %s2271_s13  ;;  %p2275_p5 = scmp.lt.u32.totalorder %s2271_s13, %s2647_s6 }
  0x4d   :  { %p2277_p6 = pnand %p2275_p5, %p2272_p4 }
  0x4f   :  { %2280 = shalt.err (!%p2277_p6)
}
  0x50   :  { %s2281_s2 = scalar_lea.vmem %s77_s16, 1024  ;;  %p2286_p8 = scmp.lt.s32.totalorder %s77_s16, %s77_s16 }
  0x51   :  { %p2282_p7 = scmp.ne.s32.totalorder %s77_s16, %s2281_s2  ;;  %p2287_p9 = scmp.lt.s32.totalorder %s2281_s2, %s2281_s2 }
  0x53   :  { %p2288_p10 = por %p2287_p9, %p2286_p8 }
  0x55   :  { %p2289_p11 = pnand %p2288_p10, %p2282_p7 }
  0x57   :  { %2292 = shalt.err (!%p2289_p11)
}
  0x58   :  { %82 = dma.hbm_to_vmem [thread:$0]  %s2647_s6, 1024, %s77_s16, [#allocation9], %s2372_s27, %s2372_s27, %s2373_s28  }
  0x59   :  { %s2293_s29 = scalar_lea.hbm %s2649_s8, 8192 }
  0x5a   :  { %p2294_p12 = scmp.ne.s32.totalorder %s2649_s8, %s2293_s29  ;;  %p2297_p13 = scmp.lt.u32.totalorder %s2293_s29, %s2649_s8 }
  0x5c   :  { %p2299_p0 = pnand %p2297_p13, %p2294_p12 }
  0x5e   :  { %2302 = shalt.err (!%p2299_p0)
}
  0x5f   :  { %s2303_s15 = scalar_lea.vmem %s2499_s19, 8192  ;;  %p2308_p2 = scmp.lt.s32.totalorder %s2499_s19, %s2499_s19 }
  0x60   :  { %p2304_p1 = scmp.ne.s32.totalorder %s2499_s19, %s2303_s15  ;;  %p2309_p3 = scmp.lt.s32.totalorder %s2303_s15, %s2303_s15 }
  0x62   :  { %p2310_p4 = por %p2309_p3, %p2308_p2 }
  0x64   :  { %p2311_p5 = pnand %p2310_p4, %p2304_p1 }
  0x66   :  { %2314 = shalt.err (!%p2311_p5)
}
  0x67   :  { %s2381_s6 = smov 512   ;;  %s2382_s27 = smov 32  }
  0x68   :  { %96 = dma.hbm_to_vmem [thread:$0]  %s2649_s8, 8192, %s2499_s19, [#allocation12], %s2381_s6, %s2381_s6, %s2382_s27  }
  0x69   :  { %2359 = dma.done.wait [#allocation3], 1024  }
  0x6a   :  { %2360 = vsyncadd [#allocation3], 4294966272 }
  0x6b   :  { %2361 = dma.done.wait [#allocation6], 8208  }
  0x6c   :  { %2362 = vsyncadd [#allocation6], 4294959088 }
  0x6d   :  { %2363 = dma.done.wait [#allocation9], 3072  }
  0x6e   :  { %2364 = vsyncadd [#allocation9], 4294964224 }
  0x6f   :  { %2365 = dma.done.wait [#allocation12], 8192  }
  0x70   :  { %2366 = vsyncadd [#allocation12], 4294959104  ;;  %v2081_v0 = vld [vmem:[#allocation5 + $0x40] sm:$0xff]   ;;  %v2085_v4 = vld [vmem:[#allocation5 + $0x48] sm:$0xff]   ;;  %vm2385_vm0 = vmmov 0  }
  0x71   :  { %v2082_v1 = vld [vmem:[#allocation5 + $0xc0] sm:$0xff]   ;;  %1947 = vmatprep.subr.bf16.mxu0 %v2081_v0  ;;  %v2086_v5 = vld [vmem:[#allocation5 + $0xc8] sm:$0xff]   ;;  %v2089_v8 = vld [vmem:[#allocation5 + $0x50] sm:$0xff]  }
  0x72   :  { %v2083_v2 = vld [vmem:[#allocation5] sm:$0xff]   ;;  %1969 = vmatprep.subr.bf16.mxu1 %v2082_v1  ;;  %v2087_v6 = vld [vmem:[#allocation5 + $0x8] sm:$0xff]   ;;  %v2090_v9 = vld [vmem:[#allocation5 + $0xd0] sm:$0xff]  }
  0x73   :  { %v2084_v3 = vld [vmem:[#allocation5 + $0x80] sm:$0xff]   ;;  %1948 = vmatpush3.bf16.msra.mxu0 %v2083_v2  ;;  %v2088_v7 = vld [vmem:[#allocation5 + $0x88] sm:$0xff]   ;;  %v2091_v10 = vld [vmem:[#allocation5 + $0x10] sm:$0xff]  }
  0x74   :  { %1970 = vmatpush3.bf16.msra.mxu1 %v2084_v3  ;;  %1949 = vmatprep.subr.bf16.mxu0 %v2085_v4  ;;  %v2092_v11 = vld [vmem:[#allocation5 + $0x90] sm:$0xff]   ;;  %v2093_v12 = vld [vmem:[#allocation5 + $0x58] sm:$0xff]   ;;  %v2097_v16 = vld [vmem:[#allocation5 + $0x60] sm:$0xff]  }
  0x75   :  { %1971 = vmatprep.subr.bf16.mxu1 %v2086_v5  ;;  %v2094_v13 = vld [vmem:[#allocation5 + $0xd8] sm:$0xff]   ;;  %v2098_v17 = vld [vmem:[#allocation5 + $0xe0] sm:$0xff]   ;;  %v2101_v20 = vld [vmem:[#allocation5 + $0x68] sm:$0xff]  }
  0x76   :  { %v2095_v14 = vld [vmem:[#allocation5 + $0x18] sm:$0xff]   ;;  %v2099_v18 = vld [vmem:[#allocation5 + $0x20] sm:$0xff]   ;;  %v2102_v21 = vld [vmem:[#allocation5 + $0xe8] sm:$0xff]  }
  0x77   :  { %1950 = vmatpush3.bf16.msra.mxu0 %v2087_v6  ;;  %v2096_v15 = vld [vmem:[#allocation5 + $0x98] sm:$0xff]   ;;  %v2100_v19 = vld [vmem:[#allocation5 + $0xa0] sm:$0xff]   ;;  %v2103_v22 = vld [vmem:[#allocation5 + $0x28] sm:$0xff]  }
  0x78   :  { %1972 = vmatpush3.bf16.msra.mxu1 %v2088_v7  ;;  %1951 = vmatprep.subr.bf16.mxu0 %v2089_v8  ;;  %v2104_v23 = vld [vmem:[#allocation5 + $0xa8] sm:$0xff]   ;;  %v2105_v24 = vld [vmem:[#allocation5 + $0x70] sm:$0xff]   ;;  %v2109_v28 = vld [vmem:[#allocation5 + $0x78] sm:$0xff]  }
  0x79   :  { %1973 = vmatprep.subr.bf16.mxu1 %v2090_v9  ;;  %v2106_v25 = vld [vmem:[#allocation5 + $0xf0] sm:$0xff]   ;;  %v2110_v29 = vld [vmem:[#allocation5 + $0xf8] sm:$0xff]   ;;  %v119_v32 = vld [vmem:[#allocation2 + $0x8] sm:$0xff] }
  0x7a   :  { %v2107_v26 = vld [vmem:[#allocation5 + $0x30] sm:$0xff]   ;;  %v2111_v30 = vld [vmem:[#allocation5 + $0x38] sm:$0xff]   ;;  %v118_v34 = vld [vmem:[#allocation2] sm:$0xff]  ;;  %v127_v35 = vpack.c.bf16 %v119_v32, %v119_v32  ;;  %v2383_v32 = vmov 0  }
  0x7b   :  { %1952 = vmatpush3.bf16.msra.mxu0 %v2091_v10  ;;  %v2108_v27 = vld [vmem:[#allocation5 + $0xb0] sm:$0xff]   ;;  %v2112_v31 = vld [vmem:[#allocation5 + $0xb8] sm:$0xff]   ;;  %v126_v37 = vpack.c.bf16 %v118_v34, %v118_v34  ;;  %v2113_v40 = vld [vmem:[#allocation5 + $0x140] sm:$0xff]   ;;  %v2384_v34 = vmov 0.0  }
  0x7c   :  { %1974 = vmatpush3.bf16.msra.mxu1 %v2092_v11  ;;  %1953 = vmatprep.subr.bf16.mxu0 %v2093_v12  ;;  %v121_v33 = vld [vmem:[#allocation2 + $0x18] sm:$0xff]  ;;  %v120_v38 = vld [vmem:[#allocation2 + $0x10] sm:$0xff]  ;;  %v2114_v41 = vld [vmem:[#allocation5 + $0x1c0] sm:$0xff]  }
  0x7d   :  { %1975 = vmatprep.subr.bf16.mxu1 %v2094_v13  ;;  %v129_v36 = vpack.c.bf16 %v121_v33, %v121_v33  ;;  %v128_v39 = vpack.c.bf16 %v120_v38, %v120_v38  ;;  %685 = vmatprep.mubr.bf16.mxu0 %v127_v35  ;;  %v2115_v42 = vld [vmem:[#allocation5 + $0x100] sm:$0xff]   ;;  %v2117_v44 = vld [vmem:[#allocation5 + $0x148] sm:$0xff]   ;;  %v2121_v48 = vld [vmem:[#allocation5 + $0x150] sm:$0xff]  }
  0x7e   :  { %v2116_v43 = vld [vmem:[#allocation5 + $0x180] sm:$0xff]   ;;  %v2118_v45 = vld [vmem:[#allocation5 + $0x1c8] sm:$0xff]   ;;  %v2122_v49 = vld [vmem:[#allocation5 + $0x1d0] sm:$0xff]  }
  0x7f   :  { %1954 = vmatpush3.bf16.msra.mxu0 %v2095_v14  ;;  %725 = vmatprep.mubr.bf16.mxu1 %v129_v36  ;;  %v2119_v46 = vld [vmem:[#allocation5 + $0x108] sm:$0xff]   ;;  %v2123_v50 = vld [vmem:[#allocation5 + $0x110] sm:$0xff]   ;;  %v2125_v52 = vld [vmem:[#allocation5 + $0x158] sm:$0xff]  }
  0x80   :  { %1976 = vmatpush3.bf16.msra.mxu1 %v2096_v15  ;;  %1955 = vmatprep.subr.bf16.mxu0 %v2097_v16  ;;  %v2120_v47 = vld [vmem:[#allocation5 + $0x188] sm:$0xff]   ;;  %v2124_v51 = vld [vmem:[#allocation5 + $0x190] sm:$0xff]   ;;  %v2126_v53 = vld [vmem:[#allocation5 + $0x1d8] sm:$0xff]  }
  0x81   :  { %1977 = vmatprep.subr.bf16.mxu1 %v2098_v17  ;;  %v2127_v54 = vld [vmem:[#allocation5 + $0x118] sm:$0xff]   ;;  %v2129_v56 = vld [vmem:[#allocation5 + $0x160] sm:$0xff]   ;;  %v2133_v60 = vld [vmem:[#allocation5 + $0x168] sm:$0xff]  }
  0x82   :  { %v2128_v55 = vld [vmem:[#allocation5 + $0x198] sm:$0xff]   ;;  %v2130_v57 = vld [vmem:[#allocation5 + $0x1e0] sm:$0xff]   ;;  %v2134_v61 = vld [vmem:[#allocation5 + $0x1e8] sm:$0xff]  }
  0x83   :  { %1956 = vmatpush3.bf16.msra.mxu0 %v2099_v18  ;;  %v2131_v58 = vld [vmem:[#allocation5 + $0x120] sm:$0xff]   ;;  %v2135_v62 = vld [vmem:[#allocation5 + $0x128] sm:$0xff]   ;;  %v2137_v0 = vld [vmem:[#allocation5 + $0x170] sm:$0xff]  }
  0x84   :  { %1978 = vmatpush3.bf16.msra.mxu1 %v2100_v19  ;;  %1957 = vmatprep.subr.bf16.mxu0 %v2101_v20  ;;  %v2132_v59 = vld [vmem:[#allocation5 + $0x1a0] sm:$0xff]   ;;  %v2136_v63 = vld [vmem:[#allocation5 + $0x1a8] sm:$0xff]   ;;  %v2138_v1 = vld [vmem:[#allocation5 + $0x1f0] sm:$0xff]  }
  0x85   :  { %1979 = vmatprep.subr.bf16.mxu1 %v2102_v21  ;;  %v2139_v2 = vld [vmem:[#allocation5 + $0x130] sm:$0xff]   ;;  %v2141_v4 = vld [vmem:[#allocation5 + $0x178] sm:$0xff]   ;;  %v2533_v8 = vld [vmem:[#allocation2 + $0x28] sm:$0xff] }
  0x86   :  { %v2140_v3 = vld [vmem:[#allocation5 + $0x1b0] sm:$0xff]   ;;  %v2142_v5 = vld [vmem:[#allocation5 + $0x1f8] sm:$0xff]   ;;  %v131_v10 = vpack.c.bf16 %v2533_v8, %v2533_v8  ;;  %v2541_v12 = vld [vmem:[#allocation2 + $0x20] sm:$0xff] }
  0x87   :  { %1958 = vmatpush3.bf16.msra.mxu0 %v2103_v22  ;;  %v2143_v6 = vld [vmem:[#allocation5 + $0x138] sm:$0xff]   ;;  %v2543_v13 = vld [vmem:[#allocation2 + $0x30] sm:$0xff]  ;;  %v130_v14 = vpack.c.bf16 %v2541_v12, %v2541_v12  ;;  %v2145_v16 = vld [vmem:[#allocation8] ss:$8 sps:$4 sm:$0xff]  }
  0x88   :  { %1980 = vmatpush3.bf16.msra.mxu1 %v2104_v23  ;;  %1959 = vmatprep.subr.bf16.mxu0 %v2105_v24  ;;  %v2144_v7 = vld [vmem:[#allocation5 + $0x1b8] sm:$0xff]   ;;  %v132_v15 = vpack.c.bf16 %v2543_v13, %v2543_v13  ;;  %v2147_v17 = vld [vmem:[#allocation8 + $0x4] ss:$8 sps:$4 sm:$0xff]   ;;  %v2151_v21 = vld [vmem:[#allocation8 + $0x20] ss:$8 sps:$4 sm:$0xff]  }
  0x89   :  { %1981 = vmatprep.subr.bf16.mxu1 %v2106_v25  ;;  %v2535_v9 = vld [vmem:[#allocation2 + $0x38] sm:$0xff]  ;;  %v2153_v20 = vld [vmem:[#allocation8 + $0x24] ss:$8 sps:$4 sm:$0xff]   ;;  %v2157_v25 = vld [vmem:[#allocation8 + $0x40] ss:$8 sps:$4 sm:$0xff]  }
  0x8a   :  { %v133_v11 = vpack.c.bf16 %v2535_v9, %v2535_v9  ;;  %v2150_v18 = vld [vmem:[#allocation8 + $0x14] ss:$8 sps:$4 sm:$0xff]   ;;  %v2148_v19 = vld [vmem:[#allocation8 + $0x10] ss:$8 sps:$4 sm:$0xff]   ;;  %v2159_v24 = vld [vmem:[#allocation8 + $0x44] ss:$8 sps:$4 sm:$0xff]  }
  0x8b   :  { %1960 = vmatpush3.bf16.msra.mxu0 %v2107_v26  ;;  %v2156_v22 = vld [vmem:[#allocation8 + $0x34] ss:$8 sps:$4 sm:$0xff]   ;;  %v2154_v23 = vld [vmem:[#allocation8 + $0x30] ss:$8 sps:$4 sm:$0xff]   ;;  %v2169_v33 = vld [vmem:[#allocation10] sm:$0xff]  }
  0x8c   :  { %1982 = vmatpush3.bf16.msra.mxu1 %v2108_v27  ;;  %1961 = vmatprep.subr.bf16.mxu0 %v2109_v28  ;;  %v2162_v26 = vld [vmem:[#allocation8 + $0x54] ss:$8 sps:$4 sm:$0xff]   ;;  %v2160_v27 = vld [vmem:[#allocation8 + $0x50] ss:$8 sps:$4 sm:$0xff]   ;;  %v2165_v28 = vld [vmem:[#allocation8 + $0x64] ss:$8 sps:$4 sm:$0xff]  }
  0x8d   :  { %1983 = vmatprep.subr.bf16.mxu1 %v2110_v29  ;;  %v2163_v29 = vld [vmem:[#allocation8 + $0x60] ss:$8 sps:$4 sm:$0xff]   ;;  %v1784_v38 = vld [vmem:[#allocation7] ss:$0 sm:$0xff] }
  0x8e   :  { %v2170_v35 = vld [vmem:[#allocation10 + $0x8] sm:$0xff]  }
  0x8f   :  { %1962 = vmatpush3.bf16.msra.mxu0 %v2111_v30  ;;  %v2168_v30 = vld [vmem:[#allocation8 + $0x74] ss:$8 sps:$4 sm:$0xff]  }
  0x90   :  { %1984 = vmatpush3.bf16.msra.mxu1 %v2112_v31  ;;  %1991 = vmatprep.subr.bf16.mxu0 %v2113_v40  ;;  %v2166_v31 = vld [vmem:[#allocation8 + $0x70] ss:$8 sps:$4 sm:$0xff]  }
  0x91   :  { %2013 = vmatprep.subr.bf16.mxu1 %v2114_v41 }
  0x92   :  { %686 = vmatmul.mubr.bf16.vlgmr.msra.gmra.mrb[0].mxu0 %v126_v37 }
  0x93   :  { %726 = vmatmul.mubr.bf16.vlgmr.msra.gmra.mrb[0].mxu1 %v128_v39  ;;  %1992 = vmatpush3.bf16.msra.mxu0 %v2115_v42 }
  0x94   :  { %2014 = vmatpush3.bf16.msra.mxu1 %v2116_v43  ;;  %1993 = vmatprep.subr.bf16.mxu0 %v2117_v44 }
  0x95   :  { %2015 = vmatprep.subr.bf16.mxu1 %v2118_v45  ;;  %765 = vmatprep.mubr.bf16.mxu0 %v131_v10 }
  0x96   :  { %805 = vmatprep.mubr.bf16.mxu1 %v133_v11 }
  0x97   :  { %1994 = vmatpush3.bf16.msra.mxu0 %v2119_v46 }
  0x98   :  { %2016 = vmatpush3.bf16.msra.mxu1 %v2120_v47  ;;  %1995 = vmatprep.subr.bf16.mxu0 %v2121_v48 }
  0x99   :  { %2017 = vmatprep.subr.bf16.mxu1 %v2122_v49 }
  0x9b   :  { %1996 = vmatpush3.bf16.msra.mxu0 %v2123_v50 }
  0x9c   :  { %2018 = vmatpush3.bf16.msra.mxu1 %v2124_v51  ;;  %1997 = vmatprep.subr.bf16.mxu0 %v2125_v52 }
  0x9d   :  { %2019 = vmatprep.subr.bf16.mxu1 %v2126_v53 }
  0x9f   :  { %1998 = vmatpush3.bf16.msra.mxu0 %v2127_v54 }
  0xa0   :  { %2020 = vmatpush3.bf16.msra.mxu1 %v2128_v55  ;;  %1999 = vmatprep.subr.bf16.mxu0 %v2129_v56 }
  0xa1   :  { %2021 = vmatprep.subr.bf16.mxu1 %v2130_v57 }
  0xa3   :  { %2000 = vmatpush3.bf16.msra.mxu0 %v2131_v58 }
  0xa4   :  { %2022 = vmatpush3.bf16.msra.mxu1 %v2132_v59  ;;  %2001 = vmatprep.subr.bf16.mxu0 %v2133_v60 }
  0xa5   :  { %2023 = vmatprep.subr.bf16.mxu1 %v2134_v61 }
  0xa7   :  { %2002 = vmatpush3.bf16.msra.mxu0 %v2135_v62 }
  0xa8   :  { %2024 = vmatpush3.bf16.msra.mxu1 %v2136_v63  ;;  %2003 = vmatprep.subr.bf16.mxu0 %v2137_v0  ;;  %v2171_v63 = vld [vmem:[#allocation10 + $0x10] sm:$0xff]   ;;  %v2172_v0 = vld [vmem:[#allocation10 + $0x18] sm:$0xff]  }
  0xa9   :  { %2025 = vmatprep.subr.bf16.mxu1 %v2138_v1  ;;  %v2173_v1 = vld [vmem:[#allocation10 + $0x20] sm:$0xff]  }
  0xab   :  { %2004 = vmatpush3.bf16.msra.mxu0 %v2139_v2  ;;  %v2174_v2 = vld [vmem:[#allocation10 + $0x28] sm:$0xff]  }
  0xac   :  { %2026 = vmatpush3.bf16.msra.mxu1 %v2140_v3  ;;  %2005 = vmatprep.subr.bf16.mxu0 %v2141_v4  ;;  %v2175_v3 = vld [vmem:[#allocation10 + $0x30] sm:$0xff]   ;;  %v2176_v4 = vld [vmem:[#allocation10 + $0x38] sm:$0xff]  }
  0xad   :  { %2027 = vmatprep.subr.bf16.mxu1 %v2142_v5  ;;  %v1084_v5 = vld [vmem:[#allocation11] sm:$0xff] }
  0xaf   :  { %2006 = vmatpush3.bf16.msra.mxu0 %v2143_v6  ;;  %v1088_v6 = vld [vmem:[#allocation11 + $0x20] sm:$0xff] }
  0xb0   :  { %2028 = vmatpush3.bf16.msra.mxu1 %v2144_v7  ;;  %923 = vmatprep.subr.bf16.mxu0 %v2147_v17  ;;  %v2551_v7 = vld [vmem:[#allocation11 + $0x8] sm:$0xff]  ;;  %v1874_v10 = vcombine.low %v1084_v5, %v1088_v6  ;;  %v1875_v11 = vcombine.high %v1084_v5, %v1088_v6 }
  0xb1   :  { %2044 = vmatprep.subr.bf16.mxu1 %v2384_v34  ;;  %v1101_v5 = vld [vmem:[#allocation11 + $0x88] sm:$0xff] }
  0xb2   :  { %766 = vmatmul.mubr.bf16.vlgmr.msra.gmra.mrb[4].mxu0 %v130_v14  ;;  %v2553_v14 = vld [vmem:[#allocation11 + $0x28] sm:$0xff] }
  0xb3   :  { %806 = vmatmul.mubr.bf16.vlgmr.msra.gmra.mrb[4].mxu1 %v132_v15  ;;  %924 = vmatpush1.bf16.msra.mxu0 %v2145_v16  ;;  %v1092_v15 = vld [vmem:[#allocation11 + $0x40] sm:$0xff]  ;;  %v1876_v17 = vcombine.low %v2551_v7, %v2553_v14  ;;  %v1105_v6 = vld [vmem:[#allocation11 + $0xa8] sm:$0xff] }
  0xb4   :  { %925 = vmatprep.subr.bf16.mxu0 %v2150_v18  ;;  %955 = vmatprep.mubr.bf16.mxu0 %v2383_v32  ;;  %v1096_v16 = vld [vmem:[#allocation11 + $0x60] sm:$0xff]  ;;  %v1877_v18 = vcombine.high %v2551_v7, %v2553_v14  ;;  %v1129_v7 = vld [vmem:[#allocation11 + $0x168] sm:$0xff] }
  0xb5   :  { %2045 = vmatpush3.bf16.msra.mxu1 %v2169_v33  ;;  %2060 = vmatprep.mubr.msk.bf16.mxu1 %vm2385_vm0, %v2384_v34 }
  0xb6   :  { %2046 = vmatprep.subr.bf16.mxu1 %v2384_v34 }
  0xb7   :  { %926 = vmatpush1.bf16.msra.mxu0 %v2148_v19  ;;  %v1883_v19 = vcombine.high %v1092_v15, %v1096_v16 }
  0xb8   :  { %927 = vmatprep.subr.bf16.mxu0 %v2153_v20  ;;  %v1882_v20 = vcombine.low %v1092_v15, %v1096_v16  ;;  %v1893_v15 = vcombine.high %v1101_v5, %v1105_v6  ;;  %v1109_v16 = vld [vmem:[#allocation11 + $0xc8] sm:$0xff] }
  0xb9   :  { %2047 = vmatpush3.bf16.msra.mxu1 %v2170_v35  ;;  %v1128_v35 = vld [vmem:[#allocation11 + $0x160] sm:$0xff] }
  0xba   :  { %2048 = vmatprep.subr.bf16.mxu1 %v2384_v34 }
  0xbb   :  { %928 = vmatpush1.bf16.msra.mxu0 %v2151_v21  ;;  %v1100_v21 = vld [vmem:[#allocation11 + $0x80] sm:$0xff] }
  0xbc   :  { %929 = vmatprep.subr.bf16.mxu0 %v2156_v22  ;;  %v1104_v22 = vld [vmem:[#allocation11 + $0xa0] sm:$0xff] }
  0xbd   :  { %2049 = vmatpush3.bf16.msra.mxu1 %v2171_v63  ;;  %v1097_v63 = vld [vmem:[#allocation11 + $0x68] sm:$0xff] }
  0xbe   :  { %2050 = vmatprep.subr.bf16.mxu1 %v2384_v34 }
  0xbf   :  { %930 = vmatpush1.bf16.msra.mxu0 %v2154_v23  ;;  %v1891_v23 = vcombine.high %v1100_v21, %v1104_v22 }
  0xc0   :  { %931 = vmatprep.subr.bf16.mxu0 %v2159_v24  ;;  %v1890_v24 = vcombine.low %v1100_v21, %v1104_v22  ;;  %v1117_v21 = vld [vmem:[#allocation11 + $0x108] sm:$0xff] }
  0xc1   :  { %2051 = vmatpush3.bf16.msra.mxu1 %v2172_v0  ;;  %v1121_v22 = vld [vmem:[#allocation11 + $0x128] sm:$0xff] }
  0xc2   :  { %2052 = vmatprep.subr.bf16.mxu1 %v2384_v34  ;;  %v1908_v14 = vcombine.low %v1117_v21, %v1121_v22 }
  0xc3   :  { %932 = vmatpush1.bf16.msra.mxu0 %v2157_v25  ;;  %v1108_v25 = vld [vmem:[#allocation11 + $0xc0] sm:$0xff] }
  0xc4   :  { %933 = vmatprep.subr.bf16.mxu0 %v2162_v26  ;;  %v1112_v26 = vld [vmem:[#allocation11 + $0xe0] sm:$0xff] }
  0xc5   :  { %2053 = vmatpush3.bf16.msra.mxu1 %v2173_v1 }
  0xc6   :  { %2054 = vmatprep.subr.bf16.mxu1 %v2384_v34 }
  0xc7   :  { %934 = vmatpush1.bf16.msra.mxu0 %v2160_v27  ;;  %v1899_v27 = vcombine.high %v1108_v25, %v1112_v26 }
  0xc8   :  { %935 = vmatprep.subr.bf16.mxu0 %v2165_v28  ;;  %v1898_v28 = vcombine.low %v1108_v25, %v1112_v26  ;;  %v1125_v25 = vld [vmem:[#allocation11 + $0x148] sm:$0xff] }
  0xc9   :  { %2055 = vmatpush3.bf16.msra.mxu1 %v2174_v2  ;;  %v1133_v26 = vld [vmem:[#allocation11 + $0x188] sm:$0xff] }
  0xca   :  { %2056 = vmatprep.subr.bf16.mxu1 %v2384_v34 }
  0xcb   :  { %936 = vmatpush1.bf16.msra.mxu0 %v2163_v29  ;;  %v1116_v29 = vld [vmem:[#allocation11 + $0x100] sm:$0xff] }
  0xcc   :  { %937 = vmatprep.subr.bf16.mxu0 %v2168_v30  ;;  %v1120_v30 = vld [vmem:[#allocation11 + $0x120] sm:$0xff] }
  0xcd   :  { %2057 = vmatpush3.bf16.msra.mxu1 %v2175_v3  ;;  %v1906_v33 = vcombine.low %v1116_v29, %v1120_v30 }
  0xce   :  { %2058 = vmatprep.subr.bf16.mxu1 %v2384_v34  ;;  %v1124_v34 = vld [vmem:[#allocation11 + $0x140] sm:$0xff] }
  0xcf   :  { %938 = vmatpush1.bf16.msra.mxu0 %v2166_v31  ;;  %v1907_v31 = vcombine.high %v1116_v29, %v1120_v30 }
  0xd0   :  { %1510 = vmatprep.subr.bf16.mxu0 %v1875_v11 }
  0xd1   :  { %2059 = vmatpush3.bf16.msra.mxu1 %v2176_v4 }
  0xd2   :  { %1551 = vmatprep.subr.bf16.mxu1 %v1877_v18  ;;  %v1113_v18 = vld [vmem:[#allocation11 + $0xe8] sm:$0xff] }
 0x165   :  { %v1963_v36 = vpop.f32.mrb[0].mxu0 }
 0x166   :  { %v1985_v37 = vpop.f32.mrb[0].mxu1  ;;  %v1964_v39 = vpop.f32.mrb[1].mxu0 }
 0x167   :  { %v1986_v40 = vpop.f32.mrb[1].mxu1  ;;  %v1965_v41 = vadd.f32 %v1964_v39, %v1963_v36  ;;  %v1966_v43 = vpop.f32.mrb[2].mxu0  ;;  %v1915_v36 = vcombine.high %v1124_v34, %v1128_v35  ;;  %v1136_v39 = vld [vmem:[#allocation11 + $0x1a0] sm:$0xff] }
 0x168   :  { %v1987_v42 = vadd.f32 %v1986_v40, %v1985_v37  ;;  %v1988_v44 = vpop.f32.mrb[2].mxu1  ;;  %v1967_v45 = vpop.f32.mrb[3].mxu0  ;;  %v1914_v37 = vcombine.low %v1124_v34, %v1128_v35  ;;  %v1141_v34 = vld [vmem:[#allocation11 + $0x1c8] sm:$0xff] }
 0x169   :  { %v1989_v46 = vpop.f32.mrb[3].mxu1  ;;  %v688_v47 = vadd.f32 %v1965_v41, %v1784_v38  ;;  %v1132_v38 = vld [vmem:[#allocation11 + $0x180] sm:$0xff]  ;;  %v831_v45 = vld [vmem:[%s2645_s4] sm:$0x3] }
 0x16a   :  { %v1923_v40 = vcombine.high %v1132_v38, %v1136_v39  ;;  %v1922_v41 = vcombine.low %v1132_v38, %v1136_v39 }
 0x16b   :  { %v728_v48 = vadd.f32 %v1987_v42, %v688_v47  ;;  %v833_v42 = vlaneseq }
 0x16d   :  { %v2560_v43 = vshrl.u32 %v833_v42, 7 }
 0x16f   :  { %v839_v44 = vsub.s32 1, %v2560_v43 }
 0x171   :  { %v840_v46 = vrot.slane %v831_v45, %v839_v44 }
 0x185   :  { %v2007_v49 = vpop.f32.mrb[4].mxu0 }
 0x186   :  { %v2029_v50 = vpop.f32.mrb[4].mxu1  ;;  %v2008_v51 = vpop.f32.mrb[5].mxu0 }
 0x187   :  { %v2009_v52 = vadd.f32 %v2008_v51, %v2007_v49  ;;  %v2030_v53 = vpop.f32.mrb[5].mxu1  ;;  %v2010_v54 = vpop.f32.mrb[6].mxu0 }
 0x188   :  { %v2031_v55 = vadd.f32 %v2030_v53, %v2029_v50  ;;  %v2032_v56 = vpop.f32.mrb[6].mxu1  ;;  %v2011_v57 = vpop.f32.mrb[7].mxu0  ;;  %v835_v54 = vsub.s32 0, %v2560_v43 }
 0x189   :  { %v768_v58 = vadd.f32 %v2009_v52, %v728_v48  ;;  %v2033_v59 = vpop.f32.mrb[7].mxu1  ;;  %v967_v57 = vld [vmem:[%s2646_s5] sm:$0xff] }
 0x18b   :  { %v808_v60 = vadd.f32 %v2031_v55, %v768_v58  ;;  %v836_v55 = vrot.slane %v831_v45, %v835_v54  ;;  %v1087_v45 = vld [vmem:[#allocation11 + $0x18] sm:$0xff] }
 0x18d   :  { %v813_v61 = vmax.f32 %v808_v60, 0.0 }
 0x18f   :  { %v814_v62 = vpack.c.bf16 %v813_v61, %v813_v61 }
 0x191   :  { %956 = vmatmul.mubr.bf16.vlgmr.msra.gmra.mrb[8].mxu0 %v814_v62  ;;  %v1093_v62 = vld [vmem:[#allocation11 + $0x48] sm:$0xff] }
 0x192   :  { %1542 = vmatprep.mubr.bf16.mxu0 %v2383_v32  ;;  %1511 = vmatpush1.bf16.msra.mxu0 %v1874_v10  ;;  %v1885_v3 = vcombine.high %v1093_v62, %v1097_v63  ;;  %v1884_v11 = vcombine.low %v1093_v62, %v1097_v63 }
 0x193   :  { %1512 = vmatprep.subr.bf16.mxu0 %v1883_v19  ;;  %v1892_v19 = vcombine.low %v1101_v5, %v1105_v6  ;;  %v1106_v5 = vld [vmem:[#allocation11 + $0xb0] sm:$0xff]  ;;  %v1103_v6 = vld [vmem:[#allocation11 + $0x98] sm:$0xff] }
 0x196   :  { %1513 = vmatpush1.bf16.msra.mxu0 %v1882_v20  ;;  %v1901_v20 = vcombine.high %v1109_v16, %v1113_v18 }
 0x197   :  { %1514 = vmatprep.subr.bf16.mxu0 %v1891_v23  ;;  %v1900_v23 = vcombine.low %v1109_v16, %v1113_v18 }
 0x19a   :  { %1515 = vmatpush1.bf16.msra.mxu0 %v1890_v24  ;;  %v1909_v24 = vcombine.high %v1117_v21, %v1121_v22  ;;  %v1114_v21 = vld [vmem:[#allocation11 + $0xf0] sm:$0xff]  ;;  %v1111_v22 = vld [vmem:[#allocation11 + $0xd8] sm:$0xff] }
 0x19b   :  { %1516 = vmatprep.subr.bf16.mxu0 %v1899_v27  ;;  %v1137_v27 = vld [vmem:[#allocation11 + $0x1a8] sm:$0xff] }
 0x19c   :  { %v1925_v29 = vcombine.high %v1133_v26, %v1137_v27  ;;  %v1924_v30 = vcombine.low %v1133_v26, %v1137_v27  ;;  %v1122_v26 = vld [vmem:[#allocation11 + $0x130] sm:$0xff]  ;;  %v1119_v27 = vld [vmem:[#allocation11 + $0x118] sm:$0xff] }
 0x19e   :  { %1517 = vmatpush1.bf16.msra.mxu0 %v1898_v28  ;;  %v1916_v28 = vcombine.low %v1125_v25, %v1129_v7 }
 0x19f   :  { %1518 = vmatprep.subr.bf16.mxu0 %v1907_v31  ;;  %v1140_v31 = vld [vmem:[#allocation11 + $0x1c0] sm:$0xff] }
 0x1a2   :  { %1519 = vmatpush1.bf16.msra.mxu0 %v1906_v33  ;;  %v1144_v33 = vld [vmem:[#allocation11 + $0x1e0] sm:$0xff] }
 0x1a3   :  { %1520 = vmatprep.subr.bf16.mxu0 %v1915_v36  ;;  %v1931_v35 = vcombine.high %v1140_v31, %v1144_v33  ;;  %v1145_v36 = vld [vmem:[#allocation11 + $0x1e8] sm:$0xff] }
 0x1a4   :  { %v1932_v38 = vcombine.low %v1141_v34, %v1145_v36  ;;  %v1933_v39 = vcombine.high %v1141_v34, %v1145_v36  ;;  %v1130_v34 = vld [vmem:[#allocation11 + $0x170] sm:$0xff]  ;;  %v1131_v36 = vld [vmem:[#allocation11 + $0x178] sm:$0xff] }
 0x1a6   :  { %1521 = vmatpush1.bf16.msra.mxu0 %v1914_v37  ;;  %v1930_v37 = vcombine.low %v1140_v31, %v1144_v33  ;;  %v1126_v33 = vld [vmem:[#allocation11 + $0x150] sm:$0xff] }
 0x1a7   :  { %1522 = vmatprep.subr.bf16.mxu0 %v1923_v40  ;;  %v1086_v40 = vld [vmem:[#allocation11 + $0x10] sm:$0xff] }
 0x1aa   :  { %1523 = vmatpush1.bf16.msra.mxu0 %v1922_v41  ;;  %v1090_v41 = vld [vmem:[#allocation11 + $0x30] sm:$0xff] }
 0x1ab   :  { %1524 = vmatprep.subr.bf16.mxu0 %v1931_v35  ;;  %v1127_v35 = vld [vmem:[#allocation11 + $0x158] sm:$0xff] }
 0x1ae   :  { %1525 = vmatpush1.bf16.msra.mxu0 %v1930_v37 }
 0x264   :  { %v957_v47 = vpop.f32.mrb[8].mxu0 }
 0x265   :  { %v959_v48 = vpop.f32.mrb[9].mxu0  ;;  %v958_v56 = vadd.f32 %v957_v47, %v836_v55  ;;  %v1879_v47 = vcombine.high %v1086_v40, %v1090_v41 }
 0x266   :  { %v2568_v49 = vadd.f32 %v959_v48, %v840_v46  ;;  %v961_v50 = vpop.f32.mrb[10].mxu0  ;;  %v1878_v46 = vcombine.low %v1086_v40, %v1090_v41  ;;  %v1091_v48 = vld [vmem:[#allocation11 + $0x38] sm:$0xff]  ;;  %v1921_v40 = vcombine.high %v1127_v35, %v1131_v36  ;;  %v1134_v41 = vld [vmem:[#allocation11 + $0x190] sm:$0xff] }
 0x267   :  { %v962_v51 = vpop.f32.mrb[11].mxu0  ;;  %v1738_v59 = vmul.f32 %v958_v56, %v958_v56  ;;  %v1880_v50 = vcombine.low %v1087_v45, %v1091_v48  ;;  %1592 = vmatprep.subr.bf16.mxu0 %v1879_v47  ;;  %v1139_v47 = vld [vmem:[#allocation11 + $0x1b8] sm:$0xff] }
 0x268   :  { %v964_v52 = vmul.f32 0.5, %v2568_v49  ;;  %v1881_v51 = vcombine.high %v1087_v45, %v1091_v48  ;;  %v1138_v45 = vld [vmem:[#allocation11 + $0x1b0] sm:$0xff]  ;;  %v1918_v48 = vcombine.low %v1126_v33, %v1130_v34 }
 0x26a   :  { %v965_v53 = vmul.f32 1.442695, %v964_v52  ;;  %v1865_v52 = vld [vmem:[%s2648_s7] ss:$0 sm:$0xff] }
 0x26c   :  { %2177 = vpow2.f32 %v965_v53 }
 0x276   :  { %v2178_v58 = vpop.eup %2177 }
 0x277   :  { %v968_v60 = vmul.f32 %v2178_v58, %v967_v57  ;;  %v1737_v61 = vmul.f32 %v2178_v58, %v2178_v58  ;;  %v1094_v57 = vld [vmem:[#allocation11 + $0x50] sm:$0xff] }
 0x279   :  { %v969_v0 = vadd.f32 %v968_v60, %v958_v56  ;;  %v1739_v1 = vadd.f32 %v1738_v59, %v1737_v61  ;;  %v1098_v59 = vld [vmem:[#allocation11 + $0x70] sm:$0xff]  ;;  %v1095_v60 = vld [vmem:[#allocation11 + $0x58] sm:$0xff] }
 0x27a   :  { %v1099_v61 = vld [vmem:[#allocation11 + $0x78] sm:$0xff] }
 0x27b   :  { %v970_v2 = vpack.c.bf16 %v969_v0, %v969_v0  ;;  %v2577_v4 = vadd.f32 -1.0, %v1739_v1  ;;  %v1887_v1 = vcombine.high %v1094_v57, %v1098_v59  ;;  %v1888_v16 = vcombine.low %v1095_v60, %v1099_v61 }
 0x27d   :  { %2061 = vmatmul.mubr.bf16.vlgmr.msra.gmra.mrb[8].mxu1 %v970_v2  ;;  %v1741_v10 = vsub.f32 %v2577_v4, %v2568_v49  ;;  %v1889_v2 = vcombine.high %v1095_v60, %v1099_v61 }
 0x27e   :  { %1552 = vmatpush1.bf16.msra.mxu1 %v1876_v17  ;;  %1583 = vmatprep.mubr.bf16.mxu1 %v2383_v32  ;;  %v1917_v17 = vcombine.high %v1125_v25, %v1129_v7 }
 0x27f   :  { %1553 = vmatprep.subr.bf16.mxu1 %v1885_v3  ;;  %v1102_v3 = vld [vmem:[#allocation11 + $0x90] sm:$0xff] }
 0x280   :  { %v1895_v18 = vcombine.high %v1102_v3, %v1106_v5 }
 0x282   :  { %1554 = vmatpush1.bf16.msra.mxu1 %v1884_v11  ;;  %v1107_v11 = vld [vmem:[#allocation11 + $0xb8] sm:$0xff] }
 0x283   :  { %1555 = vmatprep.subr.bf16.mxu1 %v1893_v15  ;;  %v1886_v15 = vcombine.low %v1094_v57, %v1098_v59  ;;  %v1896_v25 = vcombine.low %v1103_v6, %v1107_v11  ;;  %v1147_v57 = vld [vmem:[#allocation11 + $0x1f8] sm:$0xff] }
 0x286   :  { %1556 = vmatpush1.bf16.msra.mxu1 %v1892_v19  ;;  %v1897_v19 = vcombine.high %v1103_v6, %v1107_v11 }
 0x287   :  { %1557 = vmatprep.subr.bf16.mxu1 %v1901_v20  ;;  %v1110_v20 = vld [vmem:[#allocation11 + $0xd0] sm:$0xff] }
 0x288   :  { %v1903_v7 = vcombine.high %v1110_v20, %v1114_v21 }
 0x28a   :  { %1558 = vmatpush1.bf16.msra.mxu1 %v1900_v23  ;;  %v1115_v23 = vld [vmem:[#allocation11 + $0xf8] sm:$0xff] }
 0x28b   :  { %1559 = vmatprep.subr.bf16.mxu1 %v1909_v24  ;;  %v1894_v24 = vcombine.low %v1102_v3, %v1106_v5  ;;  %v1164_v3 = vsub.s32 3, %v2560_v43 }
 0x28e   :  { %1560 = vmatpush1.bf16.msra.mxu1 %v1908_v14  ;;  %v1905_v14 = vcombine.high %v1111_v22, %v1115_v23 }
 0x28f   :  { %1561 = vmatprep.subr.bf16.mxu1 %v1917_v17  ;;  %v1118_v17 = vld [vmem:[#allocation11 + $0x110] sm:$0xff] }
 0x290   :  { %v1911_v31 = vcombine.high %v1118_v17, %v1122_v26  ;;  %v1910_v37 = vcombine.low %v1118_v17, %v1122_v26 }
 0x292   :  { %1562 = vmatpush1.bf16.msra.mxu1 %v1916_v28  ;;  %v1123_v28 = vld [vmem:[#allocation11 + $0x138] sm:$0xff] }
 0x293   :  { %1563 = vmatprep.subr.bf16.mxu1 %v1925_v29  ;;  %v1902_v29 = vcombine.low %v1110_v20, %v1114_v21 }
 0x296   :  { %1564 = vmatpush1.bf16.msra.mxu1 %v1924_v30  ;;  %v1904_v30 = vcombine.low %v1111_v22, %v1115_v23 }
 0x297   :  { %1565 = vmatprep.subr.bf16.mxu1 %v1933_v39  ;;  %v1919_v39 = vcombine.high %v1126_v33, %v1130_v34  ;;  %v2182_v33 = vld [vmem:[#allocation2 + $0x18] sm:$0xff] }
 0x29a   :  { %1566 = vmatpush1.bf16.msra.mxu1 %v1932_v38  ;;  %v1912_v38 = vcombine.low %v1119_v27, %v1123_v28 }
 0x29b   :  { %1633 = vmatprep.subr.bf16.mxu1 %v1881_v51  ;;  %v1927_v51 = vcombine.high %v1134_v41, %v1138_v45 }
 0x350   :  { %v1076_v53 = vpop.f32.mrb[8].mxu1 }
 0x351   :  { %v1077_v55 = vadd.f32 %v1865_v52, %v1076_v53  ;;  %v2062_v56 = vpop.f32.mrb[9].mxu1  ;;  %v1142_v53 = vld [vmem:[#allocation11 + $0x1d0] sm:$0xff] }
 0x352   :  { %v1079_v58 = vpop.f32.mrb[10].mxu1  ;;  %v1143_v56 = vld [vmem:[#allocation11 + $0x1d8] sm:$0xff] }
 0x353   :  { %v1082_v62 = vmax.f32 %v1077_v55, 0.0  ;;  %v2063_v63 = vpop.f32.mrb[11].mxu1  ;;  %v1146_v55 = vld [vmem:[#allocation11 + $0x1f0] sm:$0xff]  ;;  %v1926_v58 = vcombine.low %v1134_v41, %v1138_v45  ;;  %v1937_v61 = vcombine.high %v1143_v56, %v1147_v57  ;;  %v1176_v41 = vsub.s32 6, %v2560_v43 }
 0x354   :  { %v1935_v60 = vcombine.high %v1142_v53, %v1146_v55  ;;  %v1936_v63 = vcombine.low %v1143_v56, %v1147_v57  ;;  %v1172_v45 = vsub.s32 5, %v2560_v43 }
 0x355   :  { %v2588_v0 = vpack.c.bf16 %v1082_v62, %v1082_v62  ;;  %v1934_v62 = vcombine.low %v1142_v53, %v1146_v55 }
 0x357   :  { %1543 = vmatmul.mubr.bf16.vlgmr.msra.gmra.mrb[12].mxu0 %v2588_v0  ;;  %1584 = vmatmul.mubr.bf16.vlgmr.msra.gmra.mrb[12].mxu1 %v2588_v0 }
 0x358   :  { %1593 = vmatpush1.bf16.msra.mxu0 %v1878_v46  ;;  %1634 = vmatpush1.bf16.msra.mxu1 %v1880_v50  ;;  %v1135_v46 = vld [vmem:[#allocation11 + $0x198] sm:$0xff]  ;;  %v1920_v50 = vcombine.low %v1127_v35, %v1131_v36 }
 0x359   :  { %1594 = vmatprep.subr.bf16.mxu0 %v1887_v1  ;;  %1635 = vmatprep.subr.bf16.mxu1 %v1889_v2  ;;  %v1929_v52 = vcombine.high %v1135_v46, %v1139_v47  ;;  %v1928_v59 = vcombine.low %v1135_v46, %v1139_v47  ;;  %v1160_v1 = vsub.s32 2, %v2560_v43  ;;  %v1148_v2 = vld [vmem:[%s2650_s9] sm:$0xff]  ;;  %v1180_v46 = vsub.s32 7, %v2560_v43  ;;  %s2386_s9 = smov [#allocation13]  }
 0x35a   :  { %1624 = vmatprep.mubr.bf16.mxu0 %v2383_v32  ;;  %1665 = vmatprep.mubr.bf16.mxu1 %v2383_v32  ;;  %v1913_v32 = vcombine.high %v1119_v27, %v1123_v28  ;;  %v1153_v5 = vrot.slane %v1148_v2, %v835_v54  ;;  %v1157_v11 = vrot.slane %v1148_v2, %v839_v44  ;;  %v2180_v54 = vld [vmem:[#allocation2 + $0x10] sm:$0xff]  ;;  %s1758_s13 = sshll.u32 %s2386_s9, 4  ;;  %s1759_s13 = int_to_ptr.vmem [resolvable:$true] %s1758_s13 }
 0x35b   :  { %v1161_v6 = vrot.slane %v1148_v2, %v1160_v1  ;;  %s2315_s21 = scalar_lea.vmem %s1759_s13, 512  ;;  %p2320_p7 = scmp.lt.s32.totalorder %s1759_s13, %s1759_s13 }
 0x35c   :  { %1595 = vmatpush1.bf16.msra.mxu0 %v1886_v15  ;;  %1636 = vmatpush1.bf16.msra.mxu1 %v1888_v16  ;;  %v1165_v15 = vrot.slane %v1148_v2, %v1164_v3  ;;  %p2316_p6 = scmp.ne.s32.totalorder %s1759_s13, %s2315_s21  ;;  %p2321_p8 = scmp.lt.s32.totalorder %s2315_s21, %s2315_s21 }
 0x35d   :  { %1596 = vmatprep.subr.bf16.mxu0 %v1895_v18  ;;  %1637 = vmatprep.subr.bf16.mxu1 %v1897_v19 }
 0x35e   :  { %p2322_p9 = por %p2321_p8, %p2320_p7 }
 0x360   :  { %1597 = vmatpush1.bf16.msra.mxu0 %v1894_v24  ;;  %1638 = vmatpush1.bf16.msra.mxu1 %v1896_v25  ;;  %p2323_p10 = pnand %p2322_p9, %p2316_p6 }
 0x361   :  { %1598 = vmatprep.subr.bf16.mxu0 %v1903_v7  ;;  %1639 = vmatprep.subr.bf16.mxu1 %v1905_v14  ;;  %v2179_v7 = vld [vmem:[#allocation2] sm:$0xff] }
 0x364   :  { %1599 = vmatpush1.bf16.msra.mxu0 %v1902_v29  ;;  %1640 = vmatpush1.bf16.msra.mxu1 %v1904_v30  ;;  %v2181_v29 = vld [vmem:[#allocation2 + $0x8] sm:$0xff] }
 0x365   :  { %1600 = vmatprep.subr.bf16.mxu0 %v1911_v31  ;;  %1641 = vmatprep.subr.bf16.mxu1 %v1913_v32 }
 0x368   :  { %1601 = vmatpush1.bf16.msra.mxu0 %v1910_v37  ;;  %1642 = vmatpush1.bf16.msra.mxu1 %v1912_v38 }
 0x369   :  { %1602 = vmatprep.subr.bf16.mxu0 %v1919_v39  ;;  %1643 = vmatprep.subr.bf16.mxu1 %v1921_v40  ;;  %v1168_v40 = vsub.s32 4, %v2560_v43 }
 0x36b   :  { %v1169_v47 = vrot.slane %v1148_v2, %v1168_v40 }
 0x36c   :  { %1603 = vmatpush1.bf16.msra.mxu0 %v1918_v48  ;;  %1644 = vmatpush1.bf16.msra.mxu1 %v1920_v50  ;;  %v1177_v48 = vrot.slane %v1148_v2, %v1176_v41  ;;  %v1173_v50 = vrot.slane %v1148_v2, %v1172_v45 }
 0x36d   :  { %1604 = vmatprep.subr.bf16.mxu0 %v1927_v51  ;;  %1645 = vmatprep.subr.bf16.mxu1 %v1929_v52  ;;  %v1181_v51 = vrot.slane %v1148_v2, %v1180_v46 }
 0x370   :  { %1605 = vmatpush1.bf16.msra.mxu0 %v1926_v58  ;;  %1646 = vmatpush1.bf16.msra.mxu1 %v1928_v59 }
 0x371   :  { %1606 = vmatprep.subr.bf16.mxu0 %v1935_v60  ;;  %1647 = vmatprep.subr.bf16.mxu1 %v1937_v61 }
 0x374   :  { %1607 = vmatpush1.bf16.msra.mxu0 %v1934_v62  ;;  %1648 = vmatpush1.bf16.msra.mxu1 %v1936_v63 }
 0x377   :  { %1625 = vmatmul.mubr.bf16.vlgmr.msra.gmra.mrb[16].mxu0 %v2588_v0  ;;  %1666 = vmatmul.mubr.bf16.vlgmr.msra.gmra.mrb[16].mxu1 %v2588_v0 }
 0x42a   :  { %v1544_v16 = vpop.f32.mrb[12].mxu0  ;;  %v1585_v18 = vpop.f32.mrb[12].mxu1 }
 0x42b   :  { %v1545_v19 = vadd.f32 %v1544_v16, %v1153_v5  ;;  %v1586_v0 = vadd.f32 %v1585_v18, %v1161_v6  ;;  %v1546_v20 = vpop.f32.mrb[13].mxu0  ;;  %v1587_v21 = vpop.f32.mrb[13].mxu1 }
 0x42c   :  { %v1547_v22 = vadd.f32 %v1546_v20, %v1157_v11  ;;  %v1588_v23 = vadd.f32 %v1587_v21, %v1165_v15  ;;  %v1548_v24 = vpop.f32.mrb[14].mxu0  ;;  %v1589_v25 = vpop.f32.mrb[14].mxu1 }
 0x42d   :  { %v1710_v14 = vsub.f32 %v2179_v7, %v1545_v19  ;;  %v1549_v17 = vpop.f32.mrb[15].mxu0  ;;  %v1590_v26 = vpop.f32.mrb[15].mxu1  ;;  %v1712_v27 = vsub.f32 %v2180_v54, %v1586_v0 }
 0x42e   :  { %v1943_v28 = vpack.c.bf16 %v1547_v22, %v1545_v19  ;;  %v1711_v44 = vsub.f32 %v2181_v29, %v1547_v22  ;;  %v1944_v30 = vpack.c.bf16 %v1588_v23, %v1586_v0  ;;  %v1713_v34 = vsub.f32 %v2182_v33, %v1588_v23 }
 0x42f   :  { %v1718_v31 = vmul.f32 %v1710_v14, %v1710_v14  ;;  %v1720_v35 = vmul.f32 %v1712_v27, %v1712_v27 }
 0x430   :  { %1706 = vst [vmem:[#allocation13] sm:$0xff] %v1943_v28  ;;  %v1719_v32 = vmul.f32 %v1711_v44, %v1711_v44  ;;  %1707 = vst [vmem:[#allocation13 + $0x8] sm:$0xff] %v1944_v30  ;;  %v1721_v37 = vmul.f32 %v1713_v34, %v1713_v34 }
 0x432   :  { %v1726_v36 = vadd.f32 %v1719_v32, %v1718_v31 }
 0x434   :  { %v1727_v38 = vadd.f32 %v1726_v36, %v1720_v35 }
 0x436   :  { %v1728_v39 = vadd.f32 %v1727_v38, %v1721_v37 }
 0x44a   :  { %v1626_v52 = vpop.f32.mrb[16].mxu0  ;;  %v1667_v53 = vpop.f32.mrb[16].mxu1 }
 0x44b   :  { %v1627_v55 = vadd.f32 %v1626_v52, %v1169_v47  ;;  %v1668_v56 = vadd.f32 %v1667_v53, %v1177_v48  ;;  %v1628_v57 = vpop.f32.mrb[17].mxu0  ;;  %v1669_v58 = vpop.f32.mrb[17].mxu1 }
 0x44c   :  { %v1629_v59 = vadd.f32 %v1628_v57, %v1173_v50  ;;  %v1670_v60 = vadd.f32 %v1669_v58, %v1181_v51  ;;  %v1630_v61 = vpop.f32.mrb[18].mxu0  ;;  %v1671_v62 = vpop.f32.mrb[18].mxu1 }
 0x44d   :  { %v1714_v63 = vsub.f32 %v2541_v12, %v1627_v55  ;;  %v1631_v1 = vpop.f32.mrb[19].mxu0  ;;  %v1672_v3 = vpop.f32.mrb[19].mxu1  ;;  %v1716_v2 = vsub.f32 %v2543_v13, %v1668_v56 }
 0x44e   :  { %v1945_v5 = vpack.c.bf16 %v1629_v59, %v1627_v55  ;;  %v1715_v43 = vsub.f32 %v2533_v8, %v1629_v59  ;;  %v1946_v6 = vpack.c.bf16 %v1670_v60, %v1668_v56  ;;  %v1717_v18 = vsub.f32 %v2535_v9, %v1670_v60 }
 0x44f   :  { %v1722_v11 = vmul.f32 %v1714_v63, %v1714_v63  ;;  %v1724_v19 = vmul.f32 %v1716_v2, %v1716_v2 }
 0x450   :  { %1708 = vst [vmem:[#allocation13 + $0x10] sm:$0xff] %v1945_v5  ;;  %v1723_v15 = vmul.f32 %v1715_v43, %v1715_v43  ;;  %1709 = vst [vmem:[#allocation13 + $0x18] sm:$0xff] %v1946_v6  ;;  %v1725_v20 = vmul.f32 %v1717_v18, %v1717_v18 }
 0x451   :  { %v1729_v16 = vadd.f32 %v1728_v39, %v1722_v11 }
 0x453   :  { %v1730_v0 = vadd.f32 %v1729_v16, %v1723_v15 }
 0x455   :  { %v1731_v21 = vadd.f32 %v1730_v0, %v1724_v19 }
 0x457   :  { %v1732_v12 = vadd.f32 %v1731_v21, %v1725_v20 }
 0x459   :  { %1733 = vadd.xlane.f32.xlu0 %v1732_v12 }
 0x45d   :  { %1742 = vadd.xlane.f32.xlu0 %v1741_v10 }
 0x45e   :  { %2326 = shalt.err (!%p2323_p10)
}
 0x45f   :  { %s2327_s18 = scalar_lea.hbm %s2651_s10, 512 }
 0x460   :  { %p2328_p11 = scmp.ne.s32.totalorder %s2651_s10, %s2327_s18  ;;  %p2331_p12 = scmp.lt.u32.totalorder %s2327_s18, %s2651_s10 }
 0x462   :  { %p2333_p13 = pnand %p2331_p12, %p2328_p11 }
 0x464   :  { %2336 = shalt.err (!%p2333_p13)
}
 0x465   :  { %1761 = dma.vmem_to_hbm [thread:$0]  %s1759_s13, 512, %s2651_s10, [#allocation4]   ;;  %v1746_v9 = vand.u32 127, %v833_v42 }
 0x466   :  { %s2387_s12 = smov [#allocation14]  }
 0x467   :  { %vm1748_vm1 = vcmp.eq.s32.totalorder %v1746_v9, 1  ;;  %s1768_s14 = sshll.u32 %s2387_s12, 4  ;;  %vm1747_vm2 = vcmp.eq.s32.totalorder %v1746_v9, 0  ;;  %s1769_s14 = int_to_ptr.vmem [resolvable:$true] %s1768_s14 }
 0x468   :  { %s2337_s0 = scalar_lea.vmem %s1769_s14, 128  ;;  %p2342_p1 = scmp.lt.s32.totalorder %s1769_s14, %s1769_s14 }
 0x469   :  { %p2338_p0 = scmp.ne.s32.totalorder %s1769_s14, %s2337_s0  ;;  %p2343_p2 = scmp.lt.s32.totalorder %s2337_s0, %s2337_s0 }
 0x46b   :  { %p2344_p3 = por %p2343_p2, %p2342_p1 }
 0x46d   :  { %p2345_p4 = pnand %p2344_p3, %p2338_p0 }
 0x4e6   :  { %v1734_v8 = vpop.xlane.xlu0 %1733 }
 0x4e7   :  { %v1735_v13 = vmul.f32 0.5, %v1734_v8 }
 0x4e9   :  { %v1736_v10 = vadd.f32 940.99304, %v1735_v13 }
 0x4ea   :  { %v1743_v49 = vpop.xlane.xlu0 %1742 }
 0x4eb   :  { %v1744_v4 = vmul.f32 0.5, %v1743_v49 }
 0x4ed   :  { %v1749_v22 = vsel %vm1748_vm1, %v1744_v4, 0.0 }
 0x4ee   :  { %v1750_v23 = vsel %vm1747_vm2, %v1736_v10, %v1749_v22 }
 0x4ef   :  { %1751 = vst [vmem:[#allocation14] sm:$0xff] %v1750_v23 }
 0x4f0   :  { %2348 = shalt.err (!%p2345_p4)
}
 0x4f1   :  { %s2349_s15 = scalar_lea.hbm %s2652_s11, 128 }
 0x4f2   :  { %p2350_p5 = scmp.ne.s32.totalorder %s2652_s11, %s2349_s15  ;;  %p2353_p6 = scmp.lt.u32.totalorder %s2349_s15, %s2652_s11 }
 0x4f4   :  { %p2355_p7 = pnand %p2353_p6, %p2350_p5 }
 0x4f6   :  { %2358 = shalt.err (!%p2355_p7)
}
 0x4f7   :  { %1771 = dma.vmem_to_hbm [thread:$0]  %s1769_s14, 128, %s2652_s11, [#allocation15]  }
 0x4f8   :  { %2367 = dma.done.wait [#allocation4], 512  }
 0x4f9   :  { %2368 = vsyncadd [#allocation4], 4294966784 }
 0x4fa   :  { %2369 = dma.done.wait [#allocation15], 128  }
 0x4fb   :  { %2370 = vsyncadd [#allocation15], 4294967168 }
 0x4fc   :  { %1778 = vsyncpa [#allocation3], 1 }
 0x4fd   :  { %1779 = vsyncpa [#allocation6], 1 }
 0x4fe   :  { %1780 = vsyncpa [#allocation9], 1 }
 0x4ff   :  { %1781 = vsyncpa [#allocation12], 1 }
 0x500   :  { %1782 = vsyncpa [#allocation4], 1 }
 0x501   :  { %1783 = vsyncpa [#allocation15], 1 }

</bundles_post_ra>
